<compile_context>
chip_gen: v7x
topology: tpu7x:2x2x1
jax: 0.10.0
libtpu: 0.0.40
codegen_flags: <defaults>
</compile_context>

<pallas_src>
import functools
import math

import jax
import jax.numpy as jnp
from jax import lax
from jax.experimental import pallas as pl
from jax.experimental.pallas import tpu as pltpu


# --------------------------------------------------------------------------- #
# Kernel
# --------------------------------------------------------------------------- #
def _fused_attn_kernel(xq_ref, xkv_ref, wq_ref, bq_ref, wk_ref, bk_ref,
                       wv_ref, bv_ref, wo_ref, bo_ref, out_ref,
                       q_scr, m_scr, l_scr, acc_scr, *, use_bf16_exp):
    ki = pl.program_id(2)

    @pl.when(ki == 0)
    def _init():
        # Project Q once per (batch, q-tile) from the resident residual tile.
        # xq_ref[0]: (C, tq) bf16; contraction over C (axis 0 of both operands).
        q = lax.dot_general(xq_ref[0], wq_ref[...],
                            (((0,), (0,)), ((), ())),
                            preferred_element_type=jnp.float32) + bq_ref[...]
        q_scr[...] = q.astype(jnp.bfloat16)                       # (tq, C)
        m_scr[...] = jnp.full(m_scr.shape, -jnp.inf, dtype=jnp.float32)
        l_scr[...] = jnp.zeros(l_scr.shape, dtype=jnp.float32)
        acc_scr[...] = jnp.zeros(acc_scr.shape, dtype=jnp.float32)

    # K / V projected on the fly from the (C, tk) x tile — no qkv HBM round trip.
    xkv = xkv_ref[0]
    k = (lax.dot_general(xkv, wk_ref[...], (((0,), (0,)), ((), ())),
                         preferred_element_type=jnp.float32)
         + bk_ref[...]).astype(jnp.bfloat16)                      # (tk, C)
    v = (lax.dot_general(xkv, wv_ref[...], (((0,), (0,)), ((), ())),
                         preferred_element_type=jnp.float32)
         + bv_ref[...]).astype(jnp.bfloat16)                      # (tk, C)

    scores = lax.dot_general(q_scr[...], k, (((1,), (1,)), ((), ())),
                             preferred_element_type=jnp.float32)  # (tq, tk) f32

    m_prev = m_scr[...]
    m_new = jnp.maximum(m_prev, jnp.max(scores, axis=-1, keepdims=True))
    alpha = jnp.exp(m_prev - m_new)                               # f32 stats
    if use_bf16_exp:
        # v6e/v7x: bf16 EUP roughly doubles exp throughput; p feeds a bf16 MXU
        # matmul anyway.  m/l/alpha/acc stay f32.
        p = jnp.exp((scores - m_new).astype(jnp.bfloat16))
        p_sum = jnp.sum(p, axis=-1, keepdims=True, dtype=jnp.float32)
        p_mm = p
    else:
        # v5e has no bf16 EUP — keep the f32 path.
        p = jnp.exp(scores - m_new)
        p_sum = jnp.sum(p, axis=-1, keepdims=True)
        p_mm = p.astype(jnp.bfloat16)
    l_scr[...] = alpha * l_scr[...] + p_sum
    acc_scr[...] = alpha * acc_scr[...] + jnp.dot(
        p_mm, v, preferred_element_type=jnp.float32)
    m_scr[...] = m_new

    @pl.when(ki == pl.num_programs(2) - 1)
    def _finalize():
        attn = (acc_scr[...] * pl.reciprocal(l_scr[...], approx=True)
                ).astype(jnp.bfloat16)                            # (tq, C)
        # out_proj emitted pre-transposed as (C, tq) straight off the MXU, so no
        # XLU transpose of the large f32 tile and no XLA transpose pass outside.
        o_t = lax.dot_general(wo_ref[...], attn, (((0,), (1,)), ((), ())),
                              preferred_element_type=jnp.float32) + bo_ref[...]
        out_ref[0] = xq_ref[0].astype(jnp.float32) + o_t          # residual, f32


# --------------------------------------------------------------------------- #
# Wrapper
# --------------------------------------------------------------------------- #
def _round_up(x, m):
    return ((x + m - 1) // m) * m


def _pick_tile(total, target):
    """Largest multiple-of-128 divisor of `total` that is <= target (else full)."""
    t = (min(target, total) // 128) * 128
    while t >= 128:
        if total % t == 0:
            return t
        t -= 128
    # TODO(synk): pad the flattened spatial dim to a multiple of 128 and mask,
    # instead of silently falling back to one full-length (VMEM-heavy) tile.
    return total


def _hw_defaults():
    """(tq_target, tk_target, vmem_limit_bytes, use_bf16_exp) per TPU generation."""
    try:
        vmem = pltpu.get_tpu_info().vmem_capacity_bytes
    except Exception:
        vmem = 64 * 1024 * 1024
    try:
        kind = jax.devices()[0].device_kind.lower()
    except Exception:
        kind = ""
    use_bf16_exp = ("v6" in kind) or ("v7" in kind)    # bf16 EUP only on v6e/v7x
    if vmem >= 100 * 1024 * 1024:                      # v5e / v6e: 128 MiB physical
        return 1024, 512, 96 * 1024 * 1024, use_bf16_exp
    return 1024, 512, 48 * 1024 * 1024, use_bf16_exp   # v7x: 64 MiB per TensorCore


def vae_attention_block(x_nchw, params, *, tq_target=None, tk_target=None):
    """x_nchw: (N, C, H, W) float32. params: dict from init_params."""
    n, c, h, w = x_nchw.shape
    s = h * w
    c_pad = _round_up(c, 8)            # sublane alignment; no-op for C=32 / C=512
    pad_c = c_pad - c

    dq, dk, vmem_limit, use_bf16_exp = _hw_defaults()
    tq_target = dq if tq_target is None else tq_target
    tk_target = dk if tk_target is None else tk_target

    # NCHW -> (N, C, S) is a free reshape: channels ride the sublane axis, the
    # flattened spatial dim rides the lanes — no HBM transpose pass on either
    # side of the kernel.  Activations travel as bf16 to halve HBM reads.
    x_ncs = x_nchw.reshape(n, c, s)
    if pad_c:
        x_ncs = jnp.pad(x_ncs, ((0, 0), (0, pad_c), (0, 0)))
    x_bf16 = x_ncs.astype(jnp.bfloat16)

    # Parameter prep: fold 1/sqrt(d_head) into Wq/bq (single head -> d_head == C).
    scale = 1.0 / math.sqrt(c)

    def pad_mat(wm):
        return jnp.pad(wm, ((0, pad_c), (0, pad_c)))

    def pad_row(b):
        return jnp.pad(b, ((0, 0), (0, pad_c)))

    w_q = (pad_mat(params["wq"]) * scale).astype(jnp.bfloat16)    # (Cp, Cp)
    b_q = (pad_row(params["bq"]) * scale).astype(jnp.float32)     # (1, Cp)
    w_k = pad_mat(params["wk"]).astype(jnp.bfloat16)
    b_k = pad_row(params["bk"]).astype(jnp.float32)
    w_v = pad_mat(params["wv"]).astype(jnp.bfloat16)
    b_v = pad_row(params["bv"]).astype(jnp.float32)
    w_o = pad_mat(params["wo"]).astype(jnp.bfloat16)
    b_o = pad_row(params["bo"]).astype(jnp.float32).T             # (Cp, 1) column bias

    tq = _pick_tile(s, tq_target)
    tk = _pick_tile(s, tk_target)
    # Keep >= 2 units of "parallel" grid work so a 2-TensorCore chip (v7x) stays busy.
    while n * (s // tq) < 2 and tq % 256 == 0 and s % (tq // 2) == 0:
        tq //= 2

    grid = (n, s // tq, s // tk)
    cmap = lambda b, qi, ki: (0, 0)    # weight/bias blocks resident for whole grid

    out_ncs = pl.pallas_call(
        functools.partial(_fused_attn_kernel, use_bf16_exp=use_bf16_exp),
        out_shape=jax.ShapeDtypeStruct((n, c_pad, s), jnp.float32),
        grid_spec=pltpu.PrefetchScalarGridSpec(
            num_scalar_prefetch=0,
            grid=grid,
            in_specs=[
                pl.BlockSpec((1, c_pad, tq), lambda b, qi, ki: (b, 0, qi)),  # x: Q + residual
                pl.BlockSpec((1, c_pad, tk), lambda b, qi, ki: (b, 0, ki)),  # x: K/V source
                pl.BlockSpec((c_pad, c_pad), cmap),                          # Wq (scaled)
                pl.BlockSpec((1, c_pad), cmap),                              # bq (scaled)
                pl.BlockSpec((c_pad, c_pad), cmap),                          # Wk
                pl.BlockSpec((1, c_pad), cmap),                              # bk
                pl.BlockSpec((c_pad, c_pad), cmap),                          # Wv
                pl.BlockSpec((1, c_pad), cmap),                              # bv
                pl.BlockSpec((c_pad, c_pad), cmap),                          # Wo
                pl.BlockSpec((c_pad, 1), cmap),                              # bo (column)
            ],
            out_specs=pl.BlockSpec((1, c_pad, tq), lambda b, qi, ki: (b, 0, qi)),
            scratch_shapes=[
                pltpu.VMEM((tq, c_pad), jnp.bfloat16),    # Q tile (projected once / qi)
                pltpu.VMEM((tq, 1), jnp.float32),         # running max m
                pltpu.VMEM((tq, 1), jnp.float32),         # running denom l
                pltpu.VMEM((tq, c_pad), jnp.float32),     # output accumulator
            ],
        ),
        compiler_params=pltpu.CompilerParams(
            dimension_semantics=("parallel", "parallel", "arbitrary"),
            vmem_limit_bytes=vmem_limit),
    )(x_bf16, x_bf16, w_q, b_q, w_k, b_k, w_v, b_v, w_o, b_o)

    if pad_c:
        out_ncs = out_ncs[:, :c, :]
    return out_ncs.reshape(n, c, h, w)   # free reshape — no transpose needed


# --------------------------------------------------------------------------- #
# Params / reference / test
# --------------------------------------------------------------------------- #
def init_params(key, channels):
    """Deterministic synthetic init. in_proj: Linear(C, 3C), out_proj: Linear(C, C).
    GroupNorm(32, C) params exist in the torch module but are unused in forward."""
    c = channels
    k_in_w, k_in_b, k_out_w, k_out_b = jax.random.split(key, 4)
    bound_in = 1.0 / math.sqrt(c)
    w_in = jax.random.uniform(k_in_w, (3 * c, c), jnp.float32, -bound_in, bound_in)
    b_in = jax.random.uniform(k_in_b, (3 * c,), jnp.float32, -bound_in, bound_in)
    w_out = jax.random.uniform(k_out_w, (c, c), jnp.float32, -bound_in, bound_in)
    b_out = jax.random.uniform(k_out_b, (c,), jnp.float32, -bound_in, bound_in)

    # torch Linear computes x @ W.T + b; store pre-transposed (C_in, C_out) pieces.
    return {
        "wq": w_in[0 * c:1 * c, :].T,
        "wk": w_in[1 * c:2 * c, :].T,
        "wv": w_in[2 * c:3 * c, :].T,
        "bq": b_in[0 * c:1 * c][None, :],
        "bk": b_in[1 * c:2 * c][None, :],
        "bv": b_in[2 * c:3 * c][None, :],
        "wo": w_out.T,
        "bo": b_out[None, :],
    }


def _reference(x_nchw, params):
    """Plain-JAX f32 reference of the torch forward (silent correctness check)."""
    n, c, h, w = x_nchw.shape
    x = jnp.transpose(x_nchw.reshape(n, c, h * w), (0, 2, 1))
    q = x @ params["wq"] + params["bq"]
    k = x @ params["wk"] + params["bk"]
    v = x @ params["wv"] + params["bv"]
    s = jnp.einsum("nqc,nkc->nqk", q, k) / math.sqrt(c)
    p = jax.nn.softmax(s, axis=-1)
    o = jnp.einsum("nqk,nkc->nqc", p, v) @ params["wo"] + params["bo"]
    y = x + o
    return jnp.transpose(y, (0, 2, 1)).reshape(n, c, h, w)


if __name__ == "__main__":
    key = jax.random.PRNGKey(0)
    k_x, k_p = jax.random.split(key)

    N, C, H, W = 2, 32, 16, 16   # channels=32 keeps GroupNorm(32, C) well-formed (unused)
    x = jax.random.normal(k_x, (N, C, H, W), dtype=jnp.float32)
    params = init_params(k_p, C)

    # tq/tk targets of 128 force a 2x2 (q-tile x kv-tile) schedule at this toy
    # S=256, so the online-softmax accumulation path is actually exercised.
    out = vae_attention_block(x, params, tq_target=128, tk_target=128)
    out = jax.block_until_ready(out)

    ref = _reference(x, params)
    assert out.shape == (N, C, H, W)
    # bf16 activations/MXU operands with f32 accumulation: bf16-appropriate tolerance.
    assert jnp.allclose(out, ref, atol=3e-2, rtol=3e-2), float(jnp.max(jnp.abs(out - ref)))

    print("KERNEL_OK")
</pallas_src>

<mosaic_0001>
module attributes {stable_mosaic.version = 11 : i64} {
  func.func @_fused_attn_kernel(%arg0: i32, %arg1: i32, %arg2: i32, %arg3: memref<1x32x128xbf16, #tpu.memory_space<vmem>>, %arg4: memref<1x32x128xbf16, #tpu.memory_space<vmem>>, %arg5: memref<32x32xbf16, #tpu.memory_space<vmem>>, %arg6: memref<1x32xf32, #tpu.memory_space<vmem>>, %arg7: memref<32x32xbf16, #tpu.memory_space<vmem>>, %arg8: memref<1x32xf32, #tpu.memory_space<vmem>>, %arg9: memref<32x32xbf16, #tpu.memory_space<vmem>>, %arg10: memref<1x32xf32, #tpu.memory_space<vmem>>, %arg11: memref<32x32xbf16, #tpu.memory_space<vmem>>, %arg12: memref<32x1xf32, #tpu.memory_space<vmem>>, %arg13: memref<1x32x128xf32, #tpu.memory_space<vmem>>, %arg14: memref<128x32xbf16, #tpu.memory_space<vmem>>, %arg15: memref<128x1xf32, #tpu.memory_space<vmem>>, %arg16: memref<128x1xf32, #tpu.memory_space<vmem>>, %arg17: memref<128x32xf32, #tpu.memory_space<vmem>>) attributes {dimension_semantics = [#tpu.dimension_semantics<parallel>, #tpu.dimension_semantics<parallel>, #tpu.dimension_semantics<arbitrary>], iteration_bounds = array<i64: 2, 2, 2>, scalar_prefetch = 0 : i64, scratch_operands = 4 : i64, tpu.core_type = #tpu.core_type<tc>, window_params = [{transform_indices = @transform_0, window_bounds = array<i64: 1, 32, 128>}, {transform_indices = @transform_1, window_bounds = array<i64: 1, 32, 128>}, {pipeline_mode = #tpu.pipeline_mode<synchronous>, transform_indices = @transform_2, window_bounds = array<i64: 32, 32>}, {pipeline_mode = #tpu.pipeline_mode<synchronous>, transform_indices = @transform_3, window_bounds = array<i64: 1, 32>}, {pipeline_mode = #tpu.pipeline_mode<synchronous>, transform_indices = @transform_4, window_bounds = array<i64: 32, 32>}, {pipeline_mode = #tpu.pipeline_mode<synchronous>, transform_indices = @transform_5, window_bounds = array<i64: 1, 32>}, {pipeline_mode = #tpu.pipeline_mode<synchronous>, transform_indices = @transform_6, window_bounds = array<i64: 32, 32>}, {pipeline_mode = #tpu.pipeline_mode<synchronous>, transform_indices = @transform_7, window_bounds = array<i64: 1, 32>}, {pipeline_mode = #tpu.pipeline_mode<synchronous>, transform_indices = @transform_8, window_bounds = array<i64: 32, 32>}, {pipeline_mode = #tpu.pipeline_mode<synchronous>, transform_indices = @transform_9, window_bounds = array<i64: 32, 1>}, {transform_indices = @transform_10, window_bounds = array<i64: 1, 32, 128>}]} {
    %c0_i32 = arith.constant 0 : i32
    %0 = arith.cmpi eq, %arg2, %c0_i32 : i32
    %1 = arith.extui %0 : i1 to i32
    %c0_i32_0 = arith.constant 0 : i32
    %2 = arith.cmpi ne, %1, %c0_i32_0 : i32
    scf.if %2 {
      %c0_31 = arith.constant 0 : index
      %c0_32 = arith.constant 0 : index
      %c0_33 = arith.constant 0 : index
      %45 = vector.load %arg3[%c0_31, %c0_32, %c0_33] : memref<1x32x128xbf16, #tpu.memory_space<vmem>>, vector<1x32x128xbf16>
      %46 = vector.shape_cast %45 : vector<1x32x128xbf16> to vector<32x128xbf16>
      %c0_34 = arith.constant 0 : index
      %c0_35 = arith.constant 0 : index
      %47 = vector.load %arg5[%c0_34, %c0_35] : memref<32x32xbf16, #tpu.memory_space<vmem>>, vector<32x32xbf16>
      %cst_36 = arith.constant dense<0.000000e+00> : vector<128x32xf32>
      %48 = tpu.matmul %46, %47, %cst_36 {dimension_numbers = #tpu.dot_dimension_numbers<[0], [0], [1], [1], [0, 1, 1, 1], [], []>} : vector<32x128xbf16>, vector<32x32xbf16>, vector<128x32xf32> -> vector<128x32xf32>
      %c0_37 = arith.constant 0 : index
      %c0_38 = arith.constant 0 : index
      %49 = vector.load %arg6[%c0_37, %c0_38] : memref<1x32xf32, #tpu.memory_space<vmem>>, vector<1x32xf32>
      %50 = vector.broadcast %49 : vector<1x32xf32> to vector<128x32xf32>
      %51 = arith.addf %48, %50 : vector<128x32xf32>
      %52 = arith.truncf %51 : vector<128x32xf32> to vector<128x32xbf16>
      %c0_39 = arith.constant 0 : index
      %c0_40 = arith.constant 0 : index
      %53 = vector.load %arg14[%c0_39, %c0_40] : memref<128x32xbf16, #tpu.memory_space<vmem>>, vector<128x32xbf16>
      tpu.vector_store %arg14[%c0_39, %c0_40], %52 {strides = array<i32>} : memref<128x32xbf16, #tpu.memory_space<vmem>>, vector<128x32xbf16>,
      %cst_41 = arith.constant 0xFF800000 : f32
      %54 = vector.broadcast %cst_41 : f32 to vector<128x1xf32>
      %c0_42 = arith.constant 0 : index
      %c0_43 = arith.constant 0 : index
      %55 = vector.load %arg15[%c0_42, %c0_43] : memref<128x1xf32, #tpu.memory_space<vmem>>, vector<128x1xf32>
      tpu.vector_store %arg15[%c0_42, %c0_43], %54 {strides = array<i32>} : memref<128x1xf32, #tpu.memory_space<vmem>>, vector<128x1xf32>,
      %cst_44 = arith.constant 0.000000e+00 : f32
      %56 = vector.broadcast %cst_44 : f32 to vector<128x1xf32>
      %c0_45 = arith.constant 0 : index
      %c0_46 = arith.constant 0 : index
      %57 = vector.load %arg16[%c0_45, %c0_46] : memref<128x1xf32, #tpu.memory_space<vmem>>, vector<128x1xf32>
      tpu.vector_store %arg16[%c0_45, %c0_46], %56 {strides = array<i32>} : memref<128x1xf32, #tpu.memory_space<vmem>>, vector<128x1xf32>,
      %cst_47 = arith.constant 0.000000e+00 : f32
      %58 = vector.broadcast %cst_47 : f32 to vector<128x32xf32>
      %c0_48 = arith.constant 0 : index
      %c0_49 = arith.constant 0 : index
      %59 = vector.load %arg17[%c0_48, %c0_49] : memref<128x32xf32, #tpu.memory_space<vmem>>, vector<128x32xf32>
      tpu.vector_store %arg17[%c0_48, %c0_49], %58 {strides = array<i32>} : memref<128x32xf32, #tpu.memory_space<vmem>>, vector<128x32xf32>,
    } else {
    }
    %c0 = arith.constant 0 : index
    %c0_1 = arith.constant 0 : index
    %c0_2 = arith.constant 0 : index
    %3 = vector.load %arg4[%c0, %c0_1, %c0_2] : memref<1x32x128xbf16, #tpu.memory_space<vmem>>, vector<1x32x128xbf16>
    %4 = vector.shape_cast %3 : vector<1x32x128xbf16> to vector<32x128xbf16>
    %c0_3 = arith.constant 0 : index
    %c0_4 = arith.constant 0 : index
    %5 = vector.load %arg7[%c0_3, %c0_4] : memref<32x32xbf16, #tpu.memory_space<vmem>>, vector<32x32xbf16>
    %cst = arith.constant dense<0.000000e+00> : vector<128x32xf32>
    %6 = tpu.matmul %4, %5, %cst {dimension_numbers = #tpu.dot_dimension_numbers<[0], [0], [1], [1], [0, 1, 1, 1], [], []>} : vector<32x128xbf16>, vector<32x32xbf16>, vector<128x32xf32> -> vector<128x32xf32>
    %c0_5 = arith.constant 0 : index
    %c0_6 = arith.constant 0 : index
    %7 = vector.load %arg8[%c0_5, %c0_6] : memref<1x32xf32, #tpu.memory_space<vmem>>, vector<1x32xf32>
    %8 = vector.broadcast %7 : vector<1x32xf32> to vector<128x32xf32>
    %9 = arith.addf %6, %8 : vector<128x32xf32>
    %10 = arith.truncf %9 : vector<128x32xf32> to vector<128x32xbf16>
    %c0_7 = arith.constant 0 : index
    %c0_8 = arith.constant 0 : index
    %11 = vector.load %arg9[%c0_7, %c0_8] : memref<32x32xbf16, #tpu.memory_space<vmem>>, vector<32x32xbf16>
    %cst_9 = arith.constant dense<0.000000e+00> : vector<128x32xf32>
    %12 = tpu.matmul %4, %11, %cst_9 {dimension_numbers = #tpu.dot_dimension_numbers<[0], [0], [1], [1], [0, 1, 1, 1], [], []>} : vector<32x128xbf16>, vector<32x32xbf16>, vector<128x32xf32> -> vector<128x32xf32>
    %c0_10 = arith.constant 0 : index
    %c0_11 = arith.constant 0 : index
    %13 = vector.load %arg10[%c0_10, %c0_11] : memref<1x32xf32, #tpu.memory_space<vmem>>, vector<1x32xf32>
    %14 = vector.broadcast %13 : vector<1x32xf32> to vector<128x32xf32>
    %15 = arith.addf %12, %14 : vector<128x32xf32>
    %16 = arith.truncf %15 : vector<128x32xf32> to vector<128x32xbf16>
    %c0_12 = arith.constant 0 : index
    %c0_13 = arith.constant 0 : index
    %17 = vector.load %arg14[%c0_12, %c0_13] : memref<128x32xbf16, #tpu.memory_space<vmem>>, vector<128x32xbf16>
    %cst_14 = arith.constant dense<0.000000e+00> : vector<128x128xf32>
    %18 = tpu.matmul %17, %10, %cst_14 {dimension_numbers = #tpu.dot_dimension_numbers<[1], [1], [0], [0], [0, 0, 1, 0], [], []>} : vector<128x32xbf16>, vector<128x32xbf16>, vector<128x128xf32> -> vector<128x128xf32>
    %c0_15 = arith.constant 0 : index
    %c0_16 = arith.constant 0 : index
    %19 = vector.load %arg15[%c0_15, %c0_16] : memref<128x1xf32, #tpu.memory_space<vmem>>, vector<128x1xf32>
    %cst_17 = arith.constant dense<0xFF800000> : vector<128xf32>
    %20 = vector.multi_reduction <maximumf>, %18, %cst_17 [1] : vector<128x128xf32> to vector<128xf32>
    %21 = vector.shape_cast %20 : vector<128xf32> to vector<128x1xf32>
    %22 = arith.maximumf %19, %21 : vector<128x1xf32>
    %23 = arith.subf %19, %22 : vector<128x1xf32>
    %24 = math.exp %23 : vector<128x1xf32>
    %25 = vector.broadcast %22 : vector<128x1xf32> to vector<128x128xf32>
    %26 = arith.subf %18, %25 : vector<128x128xf32>
    %27 = math.exp %26 : vector<128x128xf32>
    %cst_18 = arith.constant dense<0.000000e+00> : vector<128xf32>
    %28 = vector.multi_reduction <add>, %27, %cst_18 [1] : vector<128x128xf32> to vector<128xf32>
    %29 = vector.shape_cast %28 : vector<128xf32> to vector<128x1xf32>
    %30 = arith.truncf %27 : vector<128x128xf32> to vector<128x128xbf16>
    %c0_19 = arith.constant 0 : index
    %c0_20 = arith.constant 0 : index
    %31 = vector.load %arg16[%c0_19, %c0_20] : memref<128x1xf32, #tpu.memory_space<vmem>>, vector<128x1xf32>
    %32 = arith.mulf %24, %31 : vector<128x1xf32>
    %33 = arith.addf %32, %29 : vector<128x1xf32>
    %c0_21 = arith.constant 0 : index
    %c0_22 = arith.constant 0 : index
    %34 = vector.load %arg16[%c0_21, %c0_22] : memref<128x1xf32, #tpu.memory_space<vmem>>, vector<128x1xf32>
    tpu.vector_store %arg16[%c0_21, %c0_22], %33 {strides = array<i32>} : memref<128x1xf32, #tpu.memory_space<vmem>>, vector<128x1xf32>,
    %c0_23 = arith.constant 0 : index
    %c0_24 = arith.constant 0 : index
    %35 = vector.load %arg17[%c0_23, %c0_24] : memref<128x32xf32, #tpu.memory_space<vmem>>, vector<128x32xf32>
    %36 = vector.broadcast %24 : vector<128x1xf32> to vector<128x32xf32>
    %37 = arith.mulf %36, %35 : vector<128x32xf32>
    %cst_25 = arith.constant dense<0.000000e+00> : vector<128x32xf32>
    %38 = tpu.matmul %30, %16, %cst_25 {dimension_numbers = #tpu.dot_dimension_numbers<[1], [0], [0], [1], [0, 0, 1, 1], [], []>} : vector<128x128xbf16>, vector<128x32xbf16>, vector<128x32xf32> -> vector<128x32xf32>
    %39 = arith.addf %37, %38 : vector<128x32xf32>
    %c0_26 = arith.constant 0 : index
    %c0_27 = arith.constant 0 : index
    %40 = vector.load %arg17[%c0_26, %c0_27] : memref<128x32xf32, #tpu.memory_space<vmem>>, vector<128x32xf32>
    tpu.vector_store %arg17[%c0_26, %c0_27], %39 {strides = array<i32>} : memref<128x32xf32, #tpu.memory_space<vmem>>, vector<128x32xf32>,
    %c0_28 = arith.constant 0 : index
    %c0_29 = arith.constant 0 : index
    %41 = vector.load %arg15[%c0_28, %c0_29] : memref<128x1xf32, #tpu.memory_space<vmem>>, vector<128x1xf32>
    tpu.vector_store %arg15[%c0_28, %c0_29], %22 {strides = array<i32>} : memref<128x1xf32, #tpu.memory_space<vmem>>, vector<128x1xf32>,
    %c1_i32 = arith.constant 1 : i32
    %42 = arith.cmpi eq, %arg2, %c1_i32 : i32
    %43 = arith.extui %42 : i1 to i32
    %c0_i32_30 = arith.constant 0 : i32
    %44 = arith.cmpi ne, %43, %c0_i32_30 : i32
    scf.if %44 {
      %c0_31 = arith.constant 0 : index
      %c0_32 = arith.constant 0 : index
      %45 = vector.load %arg17[%c0_31, %c0_32] : memref<128x32xf32, #tpu.memory_space<vmem>>, vector<128x32xf32>
      %c0_33 = arith.constant 0 : index
      %c0_34 = arith.constant 0 : index
      %46 = vector.load %arg16[%c0_33, %c0_34] : memref<128x1xf32, #tpu.memory_space<vmem>>, vector<128x1xf32>
      %47 = tpu.reciprocal %46 {approx = true} : vector<128x1xf32> -> vector<128x1xf32>
      %48 = vector.broadcast %47 : vector<128x1xf32> to vector<128x32xf32>
      %49 = arith.mulf %45, %48 : vector<128x32xf32>
      %50 = arith.truncf %49 : vector<128x32xf32> to vector<128x32xbf16>
      %c0_35 = arith.constant 0 : index
      %c0_36 = arith.constant 0 : index
      %51 = vector.load %arg11[%c0_35, %c0_36] : memref<32x32xbf16, #tpu.memory_space<vmem>>, vector<32x32xbf16>
      %cst_37 = arith.constant dense<0.000000e+00> : vector<32x128xf32>
      %52 = tpu.matmul %51, %50, %cst_37 {dimension_numbers = #tpu.dot_dimension_numbers<[0], [1], [1], [0], [0, 1, 1, 0], [], []>} : vector<32x32xbf16>, vector<128x32xbf16>, vector<32x128xf32> -> vector<32x128xf32>
      %c0_38 = arith.constant 0 : index
      %c0_39 = arith.constant 0 : index
      %53 = vector.load %arg12[%c0_38, %c0_39] : memref<32x1xf32, #tpu.memory_space<vmem>>, vector<32x1xf32>
      %54 = vector.broadcast %53 : vector<32x1xf32> to vector<32x128xf32>
      %55 = arith.addf %52, %54 : vector<32x128xf32>
      %c0_40 = arith.constant 0 : index
      %c0_41 = arith.constant 0 : index
      %c0_42 = arith.constant 0 : index
      %56 = vector.load %arg3[%c0_40, %c0_41, %c0_42] : memref<1x32x128xbf16, #tpu.memory_space<vmem>>, vector<1x32x128xbf16>
      %57 = vector.shape_cast %56 : vector<1x32x128xbf16> to vector<32x128xbf16>
      %58 = arith.extf %57 : vector<32x128xbf16> to vector<32x128xf32>
      %59 = arith.addf %58, %55 : vector<32x128xf32>
      %c0_43 = arith.constant 0 : index
      %c0_44 = arith.constant 0 : index
      %c0_45 = arith.constant 0 : index
      %60 = vector.load %arg13[%c0_43, %c0_44, %c0_45] : memref<1x32x128xf32, #tpu.memory_space<vmem>>, vector<1x32x128xf32>
      %61 = vector.shape_cast %60 : vector<1x32x128xf32> to vector<32x128xf32>
      %62 = vector.shape_cast %59 : vector<32x128xf32> to vector<1x32x128xf32>
      tpu.vector_store %arg13[%c0_43, %c0_44, %c0_45], %62 {strides = array<i32>} : memref<1x32x128xf32, #tpu.memory_space<vmem>>, vector<1x32x128xf32>,
    } else {
    }
    return
  }
  func.func @transform_0(%arg0: i32, %arg1: i32, %arg2: i32) -> (i32, i32, i32) {
    %c0_i32 = arith.constant 0 : i32
    %c0_i32_0 = arith.constant 0 : i32
    return %arg0, %c0_i32, %arg1 : i32, i32, i32
  }
  func.func @transform_1(%arg0: i32, %arg1: i32, %arg2: i32) -> (i32, i32, i32) {
    %c0_i32 = arith.constant 0 : i32
    %c0_i32_0 = arith.constant 0 : i32
    return %arg0, %c0_i32, %arg2 : i32, i32, i32
  }
  func.func @transform_2(%arg0: i32, %arg1: i32, %arg2: i32) -> (i32, i32) {
    %c0_i32 = arith.constant 0 : i32
    %c0_i32_0 = arith.constant 0 : i32
    %c0_i32_1 = arith.constant 0 : i32
    return %c0_i32, %c0_i32_0 : i32, i32
  }
  func.func @transform_3(%arg0: i32, %arg1: i32, %arg2: i32) -> (i32, i32) {
    %c0_i32 = arith.constant 0 : i32
    %c0_i32_0 = arith.constant 0 : i32
    %c0_i32_1 = arith.constant 0 : i32
    return %c0_i32, %c0_i32_0 : i32, i32
  }
  func.func @transform_4(%arg0: i32, %arg1: i32, %arg2: i32) -> (i32, i32) {
    %c0_i32 = arith.constant 0 : i32
    %c0_i32_0 = arith.constant 0 : i32
    %c0_i32_1 = arith.constant 0 : i32
    return %c0_i32, %c0_i32_0 : i32, i32
  }
  func.func @transform_5(%arg0: i32, %arg1: i32, %arg2: i32) -> (i32, i32) {
    %c0_i32 = arith.constant 0 : i32
    %c0_i32_0 = arith.constant 0 : i32
    %c0_i32_1 = arith.constant 0 : i32
    return %c0_i32, %c0_i32_0 : i32, i32
  }
  func.func @transform_6(%arg0: i32, %arg1: i32, %arg2: i32) -> (i32, i32) {
    %c0_i32 = arith.constant 0 : i32
    %c0_i32_0 = arith.constant 0 : i32
    %c0_i32_1 = arith.constant 0 : i32
    return %c0_i32, %c0_i32_0 : i32, i32
  }
  func.func @transform_7(%arg0: i32, %arg1: i32, %arg2: i32) -> (i32, i32) {
    %c0_i32 = arith.constant 0 : i32
    %c0_i32_0 = arith.constant 0 : i32
    %c0_i32_1 = arith.constant 0 : i32
    return %c0_i32, %c0_i32_0 : i32, i32
  }
  func.func @transform_8(%arg0: i32, %arg1: i32, %arg2: i32) -> (i32, i32) {
    %c0_i32 = arith.constant 0 : i32
    %c0_i32_0 = arith.constant 0 : i32
    %c0_i32_1 = arith.constant 0 : i32
    return %c0_i32, %c0_i32_0 : i32, i32
  }
  func.func @transform_9(%arg0: i32, %arg1: i32, %arg2: i32) -> (i32, i32) {
    %c0_i32 = arith.constant 0 : i32
    %c0_i32_0 = arith.constant 0 : i32
    %c0_i32_1 = arith.constant 0 : i32
    return %c0_i32, %c0_i32_0 : i32, i32
  }
  func.func @transform_10(%arg0: i32, %arg1: i32, %arg2: i32) -> (i32, i32, i32) {
    %c0_i32 = arith.constant 0 : i32
    %c0_i32_0 = arith.constant 0 : i32
    return %arg0, %c0_i32, %arg1 : i32, i32, i32
  }
}

</mosaic_0001>

<bundles_post_ra>
// kernel: tpu_custom_call.1
= control target key start
LH: loop header
LB: loop body
LE: loop exit
PB: predicated region body
PF: predicated region fallthrough
CT: control target
= control target key end

     0   :  { %s4136_s0 = inlined_call_operand.hbm [shape: bf16[2,32,256], index: 0, kind: input, shape index: {}]   ;;  %s4137_s1 = inlined_call_operand.hbm [shape: bf16[2,32,256], index: 1, kind: input, shape index: {}]   ;;  %s4138_s2 = inlined_call_operand.vmem [shape: bf16[32,32], index: 2, kind: input, shape index: {}]   ;;  %s4139_s3 = inlined_call_operand.hbm [shape: f32[1,32], index: 3, kind: input, shape index: {}]   ;;  %s4140_s4 = inlined_call_operand.vmem [shape: bf16[32,32], index: 4, kind: input, shape index: {}]   ;;  %s4141_s5 = inlined_call_operand.vmem [shape: f32[1,32], index: 5, kind: input, shape index: {}]   ;;  %s4142_s6 = inlined_call_operand.vmem [shape: bf16[32,32], index: 6, kind: input, shape index: {}]   ;;  %s4143_s7 = inlined_call_operand.vmem [shape: f32[1,32], index: 7, kind: input, shape index: {}]   ;;  %s4144_s8 = inlined_call_operand.hbm [shape: bf16[32,32], index: 8, kind: input, shape index: {}]   ;;  %s4145_s9 = inlined_call_operand.vmem [shape: f32[32,1], index: 9, kind: input, shape index: {}]   ;;  %s4146_s10 = inlined_call_operand.hbm [shape: f32[2,32,256], index: 10, kind: output, shape index: {}]  }
   0x1   :  { %4175 = sst [smem:[#allocation31_spill]] %s4136_s0 }
   0x2   :  { %4176 = sst [smem:[#allocation32_spill]] %s4137_s1 }
   0x3   :  { %4177 = sst [smem:[#allocation33_spill]] %s4138_s2 }
   0x4   :  { %4178 = sst [smem:[#allocation34_spill]] %s4139_s3 }
   0x5   :  { %4179 = sst [smem:[#allocation35_spill]] %s4140_s4 }
   0x6   :  { %4180 = sst [smem:[#allocation36_spill]] %s4141_s5 }
   0x7   :  { %4181 = sst [smem:[#allocation37_spill]] %s4142_s6 }
   0x8   :  { %4182 = sst [smem:[#allocation38_spill]] %s4143_s7 }
   0x9   :  { %4183 = sst [smem:[#allocation39_spill]] %s4144_s8 }
   0xa   :  { %4184 = sst [smem:[#allocation40_spill]] %s4145_s9 }
   0xb   :  { %4185 = sst [smem:[#allocation41_spill]] %s4146_s10 }
   0xc   :  { %15 = vsyncpa [#allocation7], 0 }
   0xd   :  { %17 = vsyncpa [#allocation7 + $0x1], 0 }
   0xe   :  { %18 = vsyncpa [#allocation10], 0 }
   0xf   :  { %20 = vsyncpa [#allocation10 + $0x1], 0 }
  0x10   :  { %21 = vsyncpa [#allocation13], 0 }
  0x11   :  { %22 = vsyncpa [#allocation8], 0 }
  0x12   :  { %24 = vsyncpa [#allocation8 + $0x1], 0  ;;  %s3171_s13 = smov 0   ;;  %s3173_s14 = smov 0  }
  0x13   :  { %s3175_s15 = smov 0   ;;  %s3177_s16 = smov 0  }
  0x14   :  { %s3179_s17 = smov 0   ;;  %s3181_s18 = smov 0  }
  0x15   :  { %s3183_s19 = smov 0   ;;  %s3185_s20 = smov 0  }
  0x16   :  { %s3187_s21 = smov 0   ;;  %s3189_s22 = smov 0  }
  0x17   :  { %s3191_s23 = smov 0   ;;  %s3193_s24 = smov 0  }
  0x18   :  { %s3195_s25 = smov 0  }
  0x19 LB: > { %4186 = sst [smem:[#allocation20_spill]] %s3055_s14  ;;  %s3235_s26 = sadd.s32 4294967295, %s3099_s25   ;;  %s3099_s25 = sphi %s3195_s25, %s30_s25   ;;  %s3095_s24 = sphi %s3193_s24, %s4263_s24   ;;  %s3091_s23 = sphi %s3191_s23, %s4262_s23   ;;  %s3087_s22 = sphi %s3189_s22, %s4261_s22   ;;  %s3083_s21 = sphi %s3187_s21, %s4260_s21   ;;  %s3079_s20 = sphi %s3185_s20, %s4259_s20   ;;  %s3075_s19 = sphi %s3183_s19, %s4258_s19   ;;  %s3071_s18 = sphi %s3181_s18, %s4257_s18   ;;  %s3067_s17 = sphi %s3179_s17, %s4256_s17   ;;  %s3063_s16 = sphi %s3177_s16, %s4252_s16   ;;  %s3059_s15 = sphi %s3175_s15, %s4255_s15   ;;  %s3055_s14 = sphi %s3173_s14, %s4254_s14   ;;  %s3051_s13 = sphi %s3171_s13, %s4251_s13  }
  0x1a   : > { %4187 = sst [smem:[#allocation21_spill]] %s3063_s16  ;;  %s2248_s27 = sadd.s32 4294967294, %s3099_s25  }
  0x1b   : > { %4188 = sst [smem:[#allocation22_spill]] %s3067_s17  ;;  %p65_p0 = scmp.ne.s32.totalorder %s3071_s18, %s3067_s17 }
  0x1c   : > { %4189 = sst [smem:[#allocation23_spill]] %s3075_s19  ;;  %p66_p1 = scmp.eq.s32.totalorder %s3099_s25, 0 }
  0x1d   : > { %4190 = sst [smem:[#allocation24_spill]] %s3079_s20  ;;  %p71_p2 = scmp.ne.s32.totalorder %s3067_s17, %s3063_s16 }
  0x1e   : > { %4191 = sst [smem:[#allocation25_spill]] %s3083_s21  ;;  %p4156_p3 = scmp.eq.s32.totalorder %s3235_s26, 0 }
  0x1f   : > { %4192 = sst [smem:[#allocation26_spill]] %s3235_s26  ;;  %p3249_p4 = por %p66_p1, %p65_p0 }
  0x20   : > { %p93_p5 = scmp.ne.s32.totalorder %s3059_s15, %s3055_s14  ;;  %p3260_p6 = por %p4156_p3, %p71_p2 }
  0x21   : > { %p99_p7 = scmp.ne.s32.totalorder %s3055_s14, %s3051_s13  ;;  %p293_p9 = scmp.eq.s32.totalorder %s3235_s26, 7 }
  0x22   : > { %s4194_s11 = scalar_select %p3260_p6, 1, 0 }
  0x23   : > { %p3265_p8 = por %p93_p5, %p66_p1  ;;  %p3272_p10 = por %p99_p7, %p4156_p3 }
  0x24   : > { %4195 = sst [smem:[#allocation27_spill]] %s4194_s11  ;;  %p299_p11 = scmp.eq.s32.totalorder %s2248_s27, 7 }
  0x25   : > { %s4197_s29 = scalar_select %p3272_p10, 1, 0 }
  0x26   : > { %p3279_p12 = por %p293_p9, %p65_p0  ;;  %p2249_p13 = scmp.ge.s32.totalorder %s3099_s25, 1 }
  0x27   : > { %4198 = sst [smem:[#allocation28_spill]] %s4197_s29  ;;  %p3287_p6 = por %p299_p11, %p71_p2 }
  0x28   : > { %s4199_s28 = scalar_select %p3279_p12, 1, 0 }
  0x29   : > { %s4201_s13 = scalar_select %p3287_p6, 1, 0 }
  0x2a   : > { %4200 = sst [smem:[#allocation29_spill]] %s4199_s28  ;;  %p306_p1 = scmp.lt.s32.totalorder %s3099_s25, 9 }
  0x2b   : > { %4202 = sst [smem:[#allocation30_spill]] %s4201_s13  ;;  %s3101_s20 = smov [#allocation11]  }
  0x2c   : > { %p3292_p5 = pnand %p2249_p13, %p306_p1  ;;  %s322_s21 = sshll.u32 %s3101_s20, 4  ;;  %s323_s21 = int_to_ptr.vmem [resolvable:$true] %s322_s21 }
  0x2d   : > { %p2600_p7 = scmp.lt.s32.totalorder %s3099_s25, 8  ;;  %s3102_s20 = smov [#allocation12]  }
  0x2e   : > { %s4203_s10 = scalar_select %p3292_p5, 1, 0 }
  0x2f   : > { %p2580_p0 = pneg %p3292_p5  ;;  %p3307_p2 = pnand %p2600_p7, %p3249_p4 }
  0x30   : > { %p3313_p11 = pnand %p2600_p7, %p3265_p8  ;;  %s344_s28 = sshll.u32 %s3102_s20, 4  ;;  %s345_s28 = int_to_ptr.vmem [resolvable:$true] %s344_s28 }
  0x31   : > { %p3301_p9 = pnand %p2580_p0, %p4156_p3  ;;  %s4207_s3 = sld [smem:[#allocation34_spill]] }
  0x32   : > { %s4205_s13 = scalar_select %p3307_p2, 1, 0 }
  0x33   : > { %s4206_s16 = scalar_select %p3313_p11, 1, 0 }
  0x34   : > { %p2835_p4 = pneg %p3301_p9 }
  0x37   : > { %s2833_s5 = scalar_lea.hbm %s4207_s3, 16 }
  0x38   : > { %p2834_p13 = scmp.ne.s32.totalorder %s4207_s3, %s2833_s5  ;;  %p2840_p8 = scmp.lt.u32.totalorder %s2833_s5, %s4207_s3 }
  0x3a   : > { %p2836_p1 = pnand %p2835_p4, %p2834_p13 }
  0x3c   : > { %p2837_p0 = pneg %p2836_p1 }
  0x3e   : > { %p2842_p7 = pnand %p2840_p8, %p2837_p0 }
  0x40   : > { %2845 = shalt.err (!%p2842_p7)
}
  0x41   : > { %s2846_s20 = scalar_lea.vmem %s323_s21, 16  ;;  %s2853_s4 = scalar_lea.vmem %s323_s21, 32 }
  0x42   : > { %p2847_p3 = scmp.ne.s32.totalorder %s323_s21, %s2846_s20  ;;  %p2854_p10 = scmp.lt.s32.totalorder %s323_s21, %s323_s21 }
  0x43   : > { %p2855_p5 = scmp.lt.s32.totalorder %s2853_s4, %s2846_s20 }
  0x44   : > { %p2849_p6 = pnand %p2847_p3, %p2835_p4 }
  0x45   : > { %p2856_p11 = por %p2855_p5, %p2854_p10 }
  0x46   : > { %p2850_p12 = pneg %p2849_p6 }
  0x48   : > { %p2857_p2 = pnand %p2856_p11, %p2850_p12 }
  0x4a   : > { %2860 = shalt.err (!%p2857_p2)
}
  0x4b   : > { %2583 = dma.hbm_to_vmem [thread:$0]  (!%p3301_p9), %s4207_s3, 16, %s323_s21, [#allocation10]  }
  0x4c   : > { %s4208_s8 = sld [smem:[#allocation39_spill]] }
  0x52   : > { %s2861_s30 = scalar_lea.hbm %s4208_s8, 256 }
  0x53   : > { %p2862_p3 = scmp.ne.s32.totalorder %s4208_s8, %s2861_s30  ;;  %p2868_p12 = scmp.lt.u32.totalorder %s2861_s30, %s4208_s8 }
  0x55   : > { %p2864_p6 = pnand %p2862_p3, %p2835_p4 }
  0x57   : > { %p2865_p10 = pneg %p2864_p6 }
  0x59   : > { %p2870_p5 = pnand %p2868_p12, %p2865_p10 }
  0x5b   : > { %2873 = shalt.err (!%p2870_p5)
}
  0x5c   : > { %s2874_s21 = scalar_lea.vmem %s345_s28, 256  ;;  %p2882_p1 = scmp.lt.s32.totalorder %s345_s28, %s345_s28 }
  0x5d   : > { %p2875_p2 = scmp.ne.s32.totalorder %s345_s28, %s2874_s21  ;;  %p2883_p0 = scmp.lt.s32.totalorder %s2874_s21, %s2874_s21 }
  0x5f   : > { %p2877_p11 = pnand %p2875_p2, %p2835_p4  ;;  %p2884_p8 = por %p2883_p0, %p2882_p1 }
  0x61   : > { %p2878_p13 = pneg %p2877_p11 }
  0x63   : > { %p2885_p7 = pnand %p2884_p8, %p2878_p13 }
  0x65   : > { %2888 = shalt.err (!%p2885_p7)
}
  0x66   : > { %s4163_s2 = smov 64   ;;  %s4165_s6 = smov 4  }
  0x67   : > { %2586 = dma.hbm_to_vmem [thread:$0]  (!%p3301_p9), %s4208_s8, 256, %s345_s28, [#allocation13], %s4163_s2, %s4163_s2, %s4165_s6  }
  0x68   : > { %s45_s9 = sadd.s32 1, %s3091_s23  ;;  %s42_s30 = sadd.s32 1, %s3087_s22 }
  0x69   : > { %s49_s12 = sadd.s32 1, %s3095_s24  ;;  %p43_p4 = scmp.ge.s32.totalorder %s42_s30, 2 }
  0x6a   : > { %s361_s20 = sand.u32 1, %s3071_s18   ;;  %s2254_s21 = sshll.u32 %s3095_s24, 3 }
  0x6b   : > { %s2253_s4 = sshll.u32 %s361_s20, 4  ;;  %s4265_s30 = smov (%p43_p4, %s42_s30), 0 }
  0x6c   : > { %s4267_s9 = smov (!%p43_p4, %s45_s9), %s3091_s23  ;;  %s370_s7 = sadd.s32 %s3091_s23, %s2254_s21 }
  0x6d   : > { %p47_p3 = scmp.ge.s32.totalorder %s4267_s9, 2  ;;  %s365_s28 = scalar_lea.vmem [#allocation6], %s2253_s4 }
  0x6e   : > { %s373_s5 = sshll.u32 %s365_s28, 4  ;;  %s2255_s6 = sshll.u32 %s370_s7, 6  ;;  %s3385_s5 = int_to_ptr.vmem [resolvable:$true] %s373_s5 }
  0x6f   : > { %s4269_s9 = smov (%p47_p3, %s4267_s9), 0  ;;  %s4271_s12 = smov (!%p47_p3, %s49_s12), %s3095_s24 }
  0x70   : > { %s54_s2 = ssub.s32 %s3091_s23, %s4269_s9  ;;  %p51_p9 = scmp.ge.s32.totalorder %s4271_s12, 2 }
  0x71   : > { %s4209_s0 = sld [smem:[#allocation31_spill]]  ;;  %s3389_s4 = scalar_lea.sflag [#allocation7], %s361_s20 }
  0x72   : > { %s4273_s12 = smov (%p51_p9, %s4271_s12), 0  ;;  %p4210_p10 = scmp.ne.s32.totalorder %s4205_s13, 0 }
  0x74   : > { %p2891_p12 = pneg %p4210_p10 }
  0x77   : > { %s3383_s19 = scalar_lea.hbm %s4209_s0, %s2255_s6  ;;  %s2894_s6 = scalar_lea.hbm %s4209_s0, 1024 }
  0x78   : > { %s2889_s28 = scalar_lea.hbm %s3383_s19, 256  ;;  %p2895_p11 = scmp.lt.u32.totalorder %s3383_s19, %s4209_s0 }
  0x79   : > { %p2890_p6 = scmp.ne.s32.totalorder %s3383_s19, %s2889_s28  ;;  %p2896_p13 = scmp.lt.u32.totalorder %s2894_s6, %s2889_s28 }
  0x7a   : > { %p2898_p0 = scmp.lt.u32.totalorder %s2889_s28, %s3383_s19 }
  0x7b   : > { %p2892_p5 = pnand %p2891_p12, %p2890_p6  ;;  %p2897_p1 = por %p2896_p13, %p2895_p11 }
  0x7d   : > { %p2893_p2 = pneg %p2892_p5  ;;  %p2899_p8 = por %p2898_p0, %p2897_p1 }
  0x7f   : > { %p2900_p7 = pnand %p2899_p8, %p2893_p2 }
  0x81   : > { %2903 = shalt.err (!%p2900_p7)
}
  0x82   : > { %s2904_s20 = scalar_lea.vmem %s3385_s5, 256  ;;  %s3105_s3 = smov [#allocation6]  }
  0x83   : > { %p2905_p4 = scmp.ne.s32.totalorder %s3385_s5, %s2904_s20  ;;  %s2909_s8 = sshll.u32 %s3105_s3, 4  ;;  %s2910_s8 = int_to_ptr.vmem [resolvable:$false] %s2909_s8 }
  0x84   : > { %s2911_s27 = scalar_lea.vmem %s2910_s8, 512  ;;  %p2912_p6 = scmp.lt.s32.totalorder %s3385_s5, %s2910_s8 }
  0x85   : > { %p2907_p3 = pnand %p2905_p4, %p2891_p12  ;;  %p2913_p5 = scmp.lt.s32.totalorder %s2911_s27, %s2904_s20 }
  0x87   : > { %p2908_p9 = pneg %p2907_p3  ;;  %p2914_p11 = por %p2913_p5, %p2912_p6 }
  0x89   : > { %p2915_p13 = pnand %p2914_p11, %p2908_p9 }
  0x8b   : > { %2918 = shalt.err (!%p2915_p13)
}
  0x8c   : > { %s3106_s28 = smov 128   ;;  %s4211_s6 = smov 4  }
  0x8d   : > { %s4212_s7 = smov 64   ;;  %s53_s13 = ssub.s32 %s3095_s24, %s4273_s12 }
  0x8e   : > { %2590 = dma.hbm_to_vmem [thread:$0]  (!%p4210_p10), %s3383_s19, 256, %s3385_s5, %s3389_s4, %s3106_s28, %s4212_s7, %s4211_s6  }
  0x8f   : > { %s392_s20 = sadd.s32 %s3087_s22, %s2254_s21  ;;  %s55_s3 = sor.u32 %s54_s2, %s53_s13 }
  0x90   : > { %s4213_s8 = ssub.s32 %s3087_s22, %s4265_s30  ;;  %p56_p12 = scmp.eq.s32.totalorder %s55_s3, 0 }
  0x91   : > { %s83_s27 = sor.u32 %s4213_s8, %s53_s13  ;;  %s2258_s0 = sshll.u32 %s392_s20, 6 }
  0x92   : > { %p84_p2 = scmp.eq.s32.totalorder %s83_s27, 0  ;;  %s4214_s29 = sadd.s32 1, %s3071_s18 }
  0x93   : > { %s3434_s14 = scalar_select %p56_p12, %s3071_s18, %s4214_s29  }
  0x94   : > { %s4215_s26 = sadd.s32 1, %s3059_s15  ;;  %s383_s17 = sand.u32 1, %s3099_s25  }
  0x95   : > { %s3439_s11 = scalar_select %p84_p2, %s3059_s15, %s4215_s26  }
  0x96   : > { %s385_s19 = sand.u32 1, %s3059_s15   ;;  %s4216_s1 = sld [smem:[#allocation32_spill]] }
  0x97   : > { %s2256_s2 = sshll.u32 %s385_s19, 4  ;;  %s3450_s29 = scalar_lea.sflag [#allocation10], %s383_s17 }
  0x98   : > { %s387_s13 = scalar_lea.vmem [#allocation9], %s2256_s2  ;;  %p4217_p1 = scmp.ne.s32.totalorder %s4206_s16, 0 }
  0x99   : > { %s395_s20 = sshll.u32 %s387_s13, 4  ;;  %s3448_s20 = int_to_ptr.vmem [resolvable:$true] %s395_s20 }
  0x9a   : > { %p2921_p0 = pneg %p4217_p1 }
  0x9c   : > { %s3446_s21 = scalar_lea.hbm %s4216_s1, %s2258_s0  ;;  %s2924_s8 = scalar_lea.hbm %s4216_s1, 1024 }
  0x9d   : > { %s2919_s26 = scalar_lea.hbm %s3446_s21, 256  ;;  %p2925_p4 = scmp.lt.u32.totalorder %s3446_s21, %s4216_s1 }
  0x9e   : > { %p2920_p10 = scmp.ne.s32.totalorder %s3446_s21, %s2919_s26  ;;  %p2926_p3 = scmp.lt.u32.totalorder %s2924_s8, %s2919_s26 }
  0x9f   : > { %p2928_p6 = scmp.lt.u32.totalorder %s2919_s26, %s3446_s21 }
  0xa0   : > { %p2922_p8 = pnand %p2921_p0, %p2920_p10  ;;  %p2927_p9 = por %p2926_p3, %p2925_p4 }
  0xa2   : > { %p2923_p7 = pneg %p2922_p8  ;;  %p2929_p5 = por %p2928_p6, %p2927_p9 }
  0xa4   : > { %p2930_p11 = pnand %p2929_p5, %p2923_p7 }
  0xa6   : > { %2933 = shalt.err (!%p2930_p11)
}
  0xa7   : > { %s2934_s17 = scalar_lea.vmem %s3448_s20, 256  ;;  %s3107_s5 = smov [#allocation9]  }
  0xa8   : > { %p2935_p13 = scmp.ne.s32.totalorder %s3448_s20, %s2934_s17  ;;  %s2939_s4 = sshll.u32 %s3107_s5, 4  ;;  %s2940_s4 = int_to_ptr.vmem [resolvable:$false] %s2939_s4 }
  0xa9   : > { %s2941_s2 = scalar_lea.vmem %s2940_s4, 512  ;;  %p2942_p10 = scmp.lt.s32.totalorder %s3448_s20, %s2940_s4 }
  0xaa   : > { %p2937_p12 = pnand %p2935_p13, %p2921_p0  ;;  %p2943_p8 = scmp.lt.s32.totalorder %s2941_s2, %s2934_s17 }
  0xac   : > { %p2938_p2 = pneg %p2937_p12  ;;  %p2944_p4 = por %p2943_p8, %p2942_p10 }
  0xae   : > { %p2945_p3 = pnand %p2944_p4, %p2938_p2 }
  0xb0   : > { %2948 = shalt.err (!%p2945_p3)
}
  0xb1   : > { %2593 = dma.hbm_to_vmem [thread:$0]  (!%p4217_p1), %s3446_s21, 256, %s3448_s20, %s3450_s29, %s3106_s28, %s4212_s7, %s4211_s6  }
  0xb2   : > { %p4218_p0 = scmp.ne.s32.totalorder %s4203_s10, 0 }
  0xb3   : > { %s4219_s13 = sld [smem:[#allocation22_spill]] (!%p4218_p0)  ;;  %s4220_s26 = sld [smem:[#allocation27_spill]] (!%p4218_p0) }
  0xb4   : > { %407 = sbr.rel (%p4218_p0) target bundleno = 2146 (0x862), region = 60 }
  0xb9   : > { %s3484_s0 = sand.u32 (!%p4218_p0), 1, %s4219_s13   ;;  %p4221_p7 = scmp.ne.s32.totalorder (!%p4218_p0), %s4220_s26, 0 }
  0xba   : > { %s2260_s3 = sshll.u32 (!%p4218_p0), %s3484_s0, 4  ;;  %s410_s8 = scalar_lea.sflag (!%p4218_p0), [#allocation7], %s3484_s0 }
  0xbb   : > { %s3488_s27 = scalar_lea.vmem [#allocation6], %s2260_s3 }
  0xbc   : > { %3030 = dma.done.wait (%p4221_p7), %s410_s8, 256  }
  0xbd   : > { %3032 = vsyncadd (%p4221_p7), %s410_s8, 4294967040  ;;  %s4222_s16 = sld [smem:[#allocation26_spill]]  ;;  %s4223_s28 = sld [smem:[#allocation20_spill]] }
  0xbe   : > { %s4224_s6 = sld [smem:[#allocation28_spill]] }
  0xc3   : > { %s418_s10 = sand.u32 1, %s4222_s16   ;;  %s420_s7 = sand.u32 1, %s4223_s28  }
  0xc4   : > { %s3496_s21 = sshll.u32 %s420_s7, 4  ;;  %s419_s20 = scalar_lea.sflag [#allocation10], %s418_s10 }
  0xc5   : > { %s422_s29 = scalar_lea.vmem [#allocation9], %s3496_s21  ;;  %p4225_p1 = scmp.ne.s32.totalorder %s4224_s6, 0 }
  0xc7   : > { %3034 = dma.done.wait (%p4225_p1), %s419_s20, 256  }
  0xc8   : > { %3036 = vsyncadd (%p4225_p1), %s419_s20, 4294967040  ;;  %p4226_p9 = scmp.eq.s32.totalorder %s4222_s16, 0 }
  0xca   : > { %3038 = dma.done.wait (%p4226_p9), [#allocation10], 16   ;;  %p4227_p6 = pmov %p4226_p9 }
  0xcc   : > { %3040 = vsyncadd (%p4227_p6), [#allocation10], 4294967280  ;;  %p4228_p5 = pmov %p4227_p6 }
  0xce   : > { %3042 = dma.done.wait (%p4228_p5), [#allocation13], 256   ;;  %p4229_p11 = pmov %p4228_p5 }
  0xcf   : > { %s2264_s19 = sshll.u32 %s3484_s0, 5  ;;  %s4230_s5 = sld [smem:[#allocation23_spill]] }
  0xd0   : > { %3044 = vsyncadd (%p4229_p11), [#allocation13], 4294967040  ;;  %s3512_s17 = scalar_lea.vmem [#allocation14], %s2264_s19 }
  0xd5   : > { %p2265_p13 = scmp.ne.s32.totalorder %s4230_s5, 0 }
  0xd6   : > { %v2721_v0 = vld [vmem:[%s3488_s27] sm:$0xff] (!%p2265_p13)   ;;  %v2722_v1 = vld [vmem:[%s3488_s27 + $0x8] sm:$0xff] (!%p2265_p13)   ;;  %s4231_s13 = sld [smem:[#allocation33_spill]] (!%p2265_p13)  ;;  %vm670_vm0 = vcmask (!%p2265_p13), 7168   ;;  %vm532_vm1 = vcmask (!%p2265_p13), 261120   ;;  %v3108_v4 = vmov (!%p2265_p13), -inf  }
  0xd7   : > { %476 = sbr.rel (%p2265_p13) target bundleno = 566 (0x236), region = 80  ;;  %504 = vxpose.xlu0.c.b16.start [1/2] (short) (!%p2265_p13), %v2721_v0, 128  ;;  %671 = vst.msk [vmem:[#allocation3] sm:$0xff] (!%p2265_p13), %vm670_vm0, %v3108_v4  ;;  %672 = vst.msk [vmem:[#allocation3 + $0x8] sm:$0xff] (!%p2265_p13), %vm670_vm0, %v3108_v4  ;;  %v3109_v5 = vmov (!%p2265_p13), 0.0   ;;  %v2266_v15 = vld [vmem:[#allocation11] ss:$0 sm:$0xff] (!%p2265_p13) }
  0xd8   : > { %673 = vst.msk [vmem:[#allocation3 + $0x10] sm:$0xff] (!%p2265_p13), %vm670_vm0, %v3108_v4  ;;  %674 = vst.msk [vmem:[#allocation3 + $0x18] sm:$0xff] (!%p2265_p13), %vm670_vm0, %v3108_v4 }
  0xd9   : > { %675 = vst.msk [vmem:[#allocation3 + $0x20] sm:$0xff] (!%p2265_p13), %vm670_vm0, %v3108_v4  ;;  %676 = vst.msk [vmem:[#allocation3 + $0x28] sm:$0xff] (!%p2265_p13), %vm670_vm0, %v3108_v4 }
  0xda   : > { %677 = vst.msk [vmem:[#allocation3 + $0x30] sm:$0xff] (!%p2265_p13), %vm670_vm0, %v3108_v4  ;;  %678 = vst.msk [vmem:[#allocation3 + $0x38] sm:$0xff] (!%p2265_p13), %vm670_vm0, %v3108_v4 }
  0xdb   : > { %679 = vst.msk [vmem:[#allocation3 + $0x40] sm:$0xff] (!%p2265_p13), %vm670_vm0, %v3108_v4  ;;  %680 = vst.msk [vmem:[#allocation3 + $0x48] sm:$0xff] (!%p2265_p13), %vm670_vm0, %v3108_v4  ;;  %505 = vxpose.xlu0.c.b16.end [2/2] (short) (!%p2265_p13), %v2722_v1, 128 }
  0xdc   : > { %s4232_s26 = smov (!%p2265_p13), %s4231_s13  ;;  %v2723_v2 = vld [vmem:[%s4231_s13] sm:$0xff] (!%p2265_p13)   ;;  %681 = vst.msk [vmem:[#allocation3 + $0x50] sm:$0xff] (!%p2265_p13), %vm670_vm0, %v3108_v4  ;;  %682 = vst.msk [vmem:[#allocation3 + $0x58] sm:$0xff] (!%p2265_p13), %vm670_vm0, %v3108_v4 }
  0xdd   : > { %v2724_v3 = vld [vmem:[%s4232_s26 + $0x8] sm:$0xff] (!%p2265_p13)   ;;  %2402 = vmatprep.subr.bf16.mxu0 (!%p2265_p13), %v2723_v2  ;;  %683 = vst.msk [vmem:[#allocation3 + $0x60] sm:$0xff] (!%p2265_p13), %vm670_vm0, %v3108_v4  ;;  %684 = vst.msk [vmem:[#allocation3 + $0x68] sm:$0xff] (!%p2265_p13), %vm670_vm0, %v3108_v4  ;;  %2546 = vmatprep.subr.bf16.mxu1 (!%p2265_p13), %v2723_v2 }
  0xde   : > { %685 = vst.msk [vmem:[#allocation3 + $0x70] sm:$0xff] %vm670_vm0, %v3108_v4  ;;  %686 = vst.msk [vmem:[#allocation3 + $0x78] sm:$0xff] %vm670_vm0, %v3108_v4  ;;  %2403 = vmatpush3.bf16.msra.mxu0 %v2723_v2  ;;  %2548 = vmatpush3.bf16.msra.mxu1 %v2723_v2 }
  0xdf   : > { %687 = vst.msk [vmem:[#allocation4] sm:$0xff] %vm670_vm0, %v3109_v5  ;;  %688 = vst.msk [vmem:[#allocation4 + $0x8] sm:$0xff] %vm670_vm0, %v3109_v5  ;;  %2404 = vmatprep.subr.bf16.mxu0 %v2724_v3  ;;  %2547 = vmatprep.subr.bf16.mxu1 %v2724_v3 }
  0xe0   : > { %689 = vst.msk [vmem:[#allocation4 + $0x10] sm:$0xff] %vm670_vm0, %v3109_v5  ;;  %690 = vst.msk [vmem:[#allocation4 + $0x18] sm:$0xff] %vm670_vm0, %v3109_v5 }
  0xe1   : > { %691 = vst.msk [vmem:[#allocation4 + $0x20] sm:$0xff] %vm670_vm0, %v3109_v5  ;;  %692 = vst.msk [vmem:[#allocation4 + $0x28] sm:$0xff] %vm670_vm0, %v3109_v5 }
  0xe2   : > { %693 = vst.msk [vmem:[#allocation4 + $0x30] sm:$0xff] %vm670_vm0, %v3109_v5  ;;  %694 = vst.msk [vmem:[#allocation4 + $0x38] sm:$0xff] %vm670_vm0, %v3109_v5  ;;  %2405 = vmatpush3.bf16.msra.mxu0 %v2724_v3  ;;  %2549 = vmatpush3.bf16.msra.mxu1 %v2724_v3 }
  0xe3   : > { %695 = vst.msk [vmem:[#allocation4 + $0x40] sm:$0xff] %vm670_vm0, %v3109_v5  ;;  %696 = vst.msk [vmem:[#allocation4 + $0x48] sm:$0xff] %vm670_vm0, %v3109_v5 }
  0xe4   : > { %697 = vst.msk [vmem:[#allocation4 + $0x50] sm:$0xff] %vm670_vm0, %v3109_v5  ;;  %698 = vst.msk [vmem:[#allocation4 + $0x58] sm:$0xff] %vm670_vm0, %v3109_v5 }
  0xe5   : > { %699 = vst.msk [vmem:[#allocation4 + $0x60] sm:$0xff] %vm670_vm0, %v3109_v5  ;;  %700 = vst.msk [vmem:[#allocation4 + $0x68] sm:$0xff] %vm670_vm0, %v3109_v5 }
  0xe6   : > { %701 = vst.msk [vmem:[#allocation4 + $0x70] sm:$0xff] %vm670_vm0, %v3109_v5  ;;  %702 = vst.msk [vmem:[#allocation4 + $0x78] sm:$0xff] %vm670_vm0, %v3109_v5 }
  0xe7   : > { %703 = vst.msk [vmem:[#allocation5] sm:$0xff] %vm532_vm1, %v3109_v5  ;;  %704 = vst.msk [vmem:[#allocation5 + $0x8] sm:$0xff] %vm532_vm1, %v3109_v5 }
  0xe8   : > { %705 = vst.msk [vmem:[#allocation5 + $0x10] sm:$0xff] %vm532_vm1, %v3109_v5  ;;  %706 = vst.msk [vmem:[#allocation5 + $0x18] sm:$0xff] %vm532_vm1, %v3109_v5 }
  0xe9   : > { %707 = vst.msk [vmem:[#allocation5 + $0x20] sm:$0xff] %vm532_vm1, %v3109_v5  ;;  %708 = vst.msk [vmem:[#allocation5 + $0x28] sm:$0xff] %vm532_vm1, %v3109_v5 }
  0xea   : > { %709 = vst.msk [vmem:[#allocation5 + $0x30] sm:$0xff] %vm532_vm1, %v3109_v5  ;;  %710 = vst.msk [vmem:[#allocation5 + $0x38] sm:$0xff] %vm532_vm1, %v3109_v5 }
  0xeb   : > { %711 = vst.msk [vmem:[#allocation5 + $0x40] sm:$0xff] %vm532_vm1, %v3109_v5  ;;  %712 = vst.msk [vmem:[#allocation5 + $0x48] sm:$0xff] %vm532_vm1, %v3109_v5 }
  0xec   : > { %713 = vst.msk [vmem:[#allocation5 + $0x50] sm:$0xff] %vm532_vm1, %v3109_v5  ;;  %714 = vst.msk [vmem:[#allocation5 + $0x58] sm:$0xff] %vm532_vm1, %v3109_v5 }
  0xed   : > { %715 = vst.msk [vmem:[#allocation5 + $0x60] sm:$0xff] %vm532_vm1, %v3109_v5  ;;  %716 = vst.msk [vmem:[#allocation5 + $0x68] sm:$0xff] %vm532_vm1, %v3109_v5 }
  0xee   : > { %717 = vst.msk [vmem:[#allocation5 + $0x70] sm:$0xff] %vm532_vm1, %v3109_v5  ;;  %718 = vst.msk [vmem:[#allocation5 + $0x78] sm:$0xff] %vm532_vm1, %v3109_v5 }
 0x13d   : > { %v512_v6 = vpop.trf.xlu0 }
 0x13e   : > { %2406 = vmatprep.mubr.msk.bf16.mxu0 %vm532_vm1, %v512_v6 }
 0x141   : > { %v513_v7 = vpop.trf.xlu0 }
 0x142   : > { %2407 = vmatmul.mubr.msk.bf16.vlgmr.msra.gmra.mrb[0].mxu0 %vm532_vm1, %v513_v7 }
 0x145   : > { %v514_v8 = vpop.trf.xlu0 }
 0x146   : > { %2410 = vmatprep.mubr.msk.bf16.mxu0 %vm532_vm1, %v514_v8 }
 0x149   : > { %v515_v9 = vpop.trf.xlu0 }
 0x14a   : > { %2411 = vmatmul.mubr.msk.bf16.gmra.mrb[4].mxu0 %vm532_vm1, %v515_v9 }
 0x14d   : > { %v516_v10 = vpop.trf.xlu0 }
 0x14e   : > { %2414 = vmatprep.mubr.msk.bf16.mxu1 %vm532_vm1, %v516_v10 }
 0x151   : > { %v517_v11 = vpop.trf.xlu0 }
 0x152   : > { %2415 = vmatmul.mubr.msk.bf16.vlgmr.msra.gmra.mrb[0].mxu1 %vm532_vm1, %v517_v11 }
 0x155   : > { %v518_v12 = vpop.trf.xlu0 }
 0x156   : > { %2418 = vmatprep.mubr.msk.bf16.mxu1 %vm532_vm1, %v518_v12 }
 0x159   : > { %v519_v13 = vpop.trf.xlu0 }
 0x15a   : > { %2419 = vmatmul.mubr.msk.bf16.gmra.mrb[4].mxu1 %vm532_vm1, %v519_v13 }
 0x215   : > { %v2408_v14 = vpop.f32.mrb[0].mxu0 }
 0x216   : > { %v591_v16 = vpop.f32.mrb[1].mxu0  ;;  %v600_v18 = vadd.f32 %v2408_v14, %v2266_v15 }
 0x217   : > { %v2409_v17 = vpop.f32.mrb[2].mxu0  ;;  %v592_v21 = vadd.f32 %v2266_v15, %v591_v16 }
 0x218   : > { %v603_v19 = vadd.f32 %v2409_v17, %v2266_v15  ;;  %v594_v20 = vpop.f32.mrb[3].mxu0 }
 0x219   : > { %v595_v22 = vadd.f32 %v2266_v15, %v594_v20 }
 0x21a   : > { %v655_v23 = vpack.c.bf16 %v603_v19, %v600_v18 }
 0x21b   : > { %v654_v24 = vpack.c.bf16 %v595_v22, %v592_v21 }
 0x21c   : > { %663 = vst.msk [vmem:[#allocation2 + $0x8] sm:$0xff] %vm532_vm1, %v655_v23 }
 0x21d   : > { %662 = vst.msk [vmem:[#allocation2] sm:$0xff] %vm532_vm1, %v654_v24  ;;  %v2412_v25 = vpop.f32.mrb[4].mxu0 }
 0x21e   : > { %v607_v26 = vpop.f32.mrb[5].mxu0  ;;  %v616_v28 = vadd.f32 %v2412_v25, %v2266_v15 }
 0x21f   : > { %v2413_v27 = vpop.f32.mrb[6].mxu0  ;;  %v608_v31 = vadd.f32 %v2266_v15, %v607_v26 }
 0x220   : > { %v619_v29 = vadd.f32 %v2413_v27, %v2266_v15  ;;  %v610_v30 = vpop.f32.mrb[7].mxu0 }
 0x221   : > { %v611_v32 = vadd.f32 %v2266_v15, %v610_v30 }
 0x222   : > { %v657_v33 = vpack.c.bf16 %v619_v29, %v616_v28 }
 0x223   : > { %v656_v34 = vpack.c.bf16 %v611_v32, %v608_v31 }
 0x224   : > { %665 = vst.msk [vmem:[#allocation2 + $0x18] sm:$0xff] %vm532_vm1, %v657_v33 }
 0x225   : > { %664 = vst.msk [vmem:[#allocation2 + $0x10] sm:$0xff] %vm532_vm1, %v656_v34  ;;  %v2416_v35 = vpop.f32.mrb[0].mxu1 }
 0x226   : > { %v623_v36 = vpop.f32.mrb[1].mxu1  ;;  %v632_v38 = vadd.f32 %v2416_v35, %v2266_v15 }
 0x227   : > { %v2417_v37 = vpop.f32.mrb[2].mxu1  ;;  %v624_v41 = vadd.f32 %v2266_v15, %v623_v36 }
 0x228   : > { %v635_v39 = vadd.f32 %v2417_v37, %v2266_v15  ;;  %v626_v40 = vpop.f32.mrb[3].mxu1 }
 0x229   : > { %v627_v42 = vadd.f32 %v2266_v15, %v626_v40 }
 0x22a   : > { %v659_v43 = vpack.c.bf16 %v635_v39, %v632_v38 }
 0x22b   : > { %v658_v44 = vpack.c.bf16 %v627_v42, %v624_v41 }
 0x22c   : > { %667 = vst.msk [vmem:[#allocation2 + $0x28] sm:$0xff] %vm532_vm1, %v659_v43 }
 0x22d   : > { %666 = vst.msk [vmem:[#allocation2 + $0x20] sm:$0xff] %vm532_vm1, %v658_v44  ;;  %v2420_v45 = vpop.f32.mrb[4].mxu1 }
 0x22e   : > { %v639_v46 = vpop.f32.mrb[5].mxu1  ;;  %v648_v48 = vadd.f32 %v2420_v45, %v2266_v15 }
 0x22f   : > { %v2421_v47 = vpop.f32.mrb[6].mxu1  ;;  %v640_v51 = vadd.f32 %v2266_v15, %v639_v46 }
 0x230   : > { %v651_v49 = vadd.f32 %v2421_v47, %v2266_v15  ;;  %v642_v50 = vpop.f32.mrb[7].mxu1 }
 0x231   : > { %v643_v52 = vadd.f32 %v2266_v15, %v642_v50 }
 0x232   : > { %v661_v53 = vpack.c.bf16 %v651_v49, %v648_v48 }
 0x233   : > { %v660_v54 = vpack.c.bf16 %v643_v52, %v640_v51 }
 0x234   : > { %669 = vst.msk [vmem:[#allocation2 + $0x38] sm:$0xff] %vm532_vm1, %v661_v53 }
 0x235   : > { %668 = vst.msk [vmem:[#allocation2 + $0x30] sm:$0xff] %vm532_vm1, %v660_v54 }
 0x236 PF: > { %v2727_v55 = vld [vmem:[%s422_s29] sm:$0xff]   ;;  %v2728_v56 = vld [vmem:[%s422_s29 + $0x8] sm:$0xff]   ;;  %s4233_s6 = sld [smem:[#allocation35_spill]]  ;;  %s4234_s20 = sld [smem:[#allocation37_spill]]  ;;  %vm774_vm2 = vcmask 261120   ;;  %vm1513_vm3 = vcmask 7168  }
 0x237   : > { %746 = vxpose.xlu0.c.b16.start [1/2] (short) %v2727_v55, 128  ;;  %v1032_v5 = vld [vmem:[#allocation2] sm:$0xff]  ;;  %s4236_s3 = sld [smem:[#allocation36_spill]]  ;;  %s4237_s28 = sld [smem:[#allocation38_spill]] }
 0x238   : > { %s4238_s10 = sld [smem:[#allocation23_spill]] }
 0x23b   : > { %747 = vxpose.xlu0.c.b16.end [2/2] (short) %v2728_v56, 128 }
 0x23c   : > { %v2729_v57 = vld [vmem:[%s4233_s6] sm:$0xff]   ;;  %s4235_s5 = smov %s4234_s20  ;;  %v2731_v59 = vld [vmem:[%s4233_s6 + $0x8] sm:$0xff]  }
 0x23d   : > { %v2730_v58 = vld [vmem:[%s4234_s20] sm:$0xff]   ;;  %2422 = vmatprep.subr.bf16.mxu0 %v2729_v57  ;;  %v2732_v60 = vld [vmem:[%s4235_s5 + $0x8] sm:$0xff]  }
 0x23e   : > { %2442 = vmatprep.subr.bf16.mxu1 %v2730_v58  ;;  %2423 = vmatpush3.bf16.msra.mxu0 %v2729_v57  ;;  %v3623_v7 = vld [vmem:[%s4236_s3] ss:$0 sm:$0xff]  ;;  %p2311_p12 = scmp.ne.s32.totalorder %s4238_s10, 1 }
 0x23f   : > { %2443 = vmatpush3.bf16.msra.mxu1 %v2730_v58  ;;  %2424 = vmatprep.subr.bf16.mxu0 %v2731_v59  ;;  %v3628_v9 = vld [vmem:[%s4237_s28] ss:$0 sm:$0xff]  ;;  %s4239_s19 = sld [smem:[#allocation40_spill]] (!%p2311_p12) }
 0x240   : > { %2444 = vmatprep.subr.bf16.mxu1 %v2732_v60 }
 0x242   : > { %2425 = vmatpush3.bf16.msra.mxu0 %v2731_v59 }
 0x243   : > { %2445 = vmatpush3.bf16.msra.mxu1 %v2732_v60 }
 0x245   : > { %s4240_s4 = smov (!%p2311_p12), %s4239_s19 }
 0x29d   : > { %v754_v61 = vpop.trf.xlu0 }
 0x29e   : > { %2426 = vmatprep.mubr.msk.bf16.mxu0 %vm774_vm2, %v754_v61  ;;  %2446 = vmatprep.mubr.msk.bf16.mxu1 %vm774_vm2, %v754_v61 }
 0x2a1   : > { %v755_v62 = vpop.trf.xlu0 }
 0x2a2   : > { %2427 = vmatmul.mubr.msk.bf16.vlgmr.msra.gmra.mrb[0].mxu0 %vm774_vm2, %v755_v62  ;;  %2447 = vmatmul.mubr.msk.bf16.vlgmr.msra.gmra.mrb[0].mxu1 %vm774_vm2, %v755_v62 }
 0x2a5   : > { %v756_v63 = vpop.trf.xlu0 }
 0x2a6   : > { %2450 = vmatprep.mubr.msk.bf16.mxu1 %vm774_vm2, %v756_v63  ;;  %2430 = vmatprep.mubr.msk.bf16.mxu0 %vm774_vm2, %v756_v63 }
 0x2a9   : > { %v757_v0 = vpop.trf.xlu0 }
 0x2aa   : > { %2451 = vmatmul.mubr.msk.bf16.gmra.mrb[4].mxu1 %vm774_vm2, %v757_v0  ;;  %2431 = vmatmul.mubr.msk.bf16.gmra.mrb[4].mxu0 %vm774_vm2, %v757_v0 }
 0x2ad   : > { %v758_v1 = vpop.trf.xlu0 }
 0x2ae   : > { %2454 = vmatprep.mubr.msk.bf16.mxu1 %vm774_vm2, %v758_v1  ;;  %2434 = vmatprep.mubr.msk.bf16.mxu0 %vm774_vm2, %v758_v1 }
 0x2b1   : > { %v759_v2 = vpop.trf.xlu0 }
 0x2b2   : > { %2455 = vmatmul.mubr.msk.bf16.gmra.mrb[8].mxu1 %vm774_vm2, %v759_v2  ;;  %2435 = vmatmul.mubr.msk.bf16.gmra.mrb[8].mxu0 %vm774_vm2, %v759_v2 }
 0x2b5   : > { %v760_v3 = vpop.trf.xlu0 }
 0x2b6   : > { %2458 = vmatprep.mubr.msk.bf16.mxu1 %vm774_vm2, %v760_v3  ;;  %2438 = vmatprep.mubr.msk.bf16.mxu0 %vm774_vm2, %v760_v3 }
 0x2b9   : > { %v761_v4 = vpop.trf.xlu0 }
 0x2ba   : > { %2459 = vmatmul.mubr.msk.bf16.gmra.mrb[12].mxu1 %vm774_vm2, %v761_v4  ;;  %2439 = vmatmul.mubr.msk.bf16.gmra.mrb[12].mxu0 %vm774_vm2, %v761_v4 }
 0x2bb   : > { %2478 = vmatprep.mubr.msk.bf16.mxu0 %vm774_vm2, %v1032_v5 }
 0x375   : > { %v2428_v6 = vpop.f32.mrb[0].mxu0  ;;  %v2448_v8 = vpop.f32.mrb[0].mxu1 }
 0x376   : > { %v833_v10 = vpop.f32.mrb[1].mxu0  ;;  %v961_v11 = vpop.f32.mrb[1].mxu1  ;;  %v842_v14 = vadd.f32 %v2428_v6, %v3623_v7  ;;  %v970_v15 = vadd.f32 %v2448_v8, %v3628_v9 }
 0x377   : > { %v2429_v12 = vpop.f32.mrb[2].mxu0  ;;  %v2449_v13 = vpop.f32.mrb[2].mxu1  ;;  %v834_v20 = vadd.f32 %v3623_v7, %v833_v10  ;;  %v962_v21 = vadd.f32 %v3628_v9, %v961_v11 }
 0x378   : > { %v845_v16 = vadd.f32 %v2429_v12, %v3623_v7  ;;  %v973_v17 = vadd.f32 %v2449_v13, %v3628_v9  ;;  %v836_v18 = vpop.f32.mrb[3].mxu0  ;;  %v964_v19 = vpop.f32.mrb[3].mxu1 }
 0x379   : > { %v837_v22 = vadd.f32 %v3623_v7, %v836_v18  ;;  %v965_v23 = vadd.f32 %v3628_v9, %v964_v19 }
 0x37a   : > { %v897_v24 = vpack.c.bf16 %v845_v16, %v842_v14  ;;  %v1025_v25 = vpack.c.bf16 %v973_v17, %v970_v15 }
 0x37b   : > { %v896_v26 = vpack.c.bf16 %v837_v22, %v834_v20  ;;  %v1024_v27 = vpack.c.bf16 %v965_v23, %v962_v21 }
 0x37c   : > { %v1068_v49 = vsel %vm774_vm2, %v897_v24, 0 }
 0x37d   : > { %v2452_v28 = vpop.f32.mrb[4].mxu1  ;;  %2550 = vmatprep.subr.msk.bf16.mxu0 %vm774_vm2, %v896_v26  ;;  %2494 = vmatprep.subr.bf16.mxu1 %v1024_v27  ;;  %v1065_v29 = vsel %vm774_vm2, %v896_v26, 0  ;;  %v2432_v30 = vpop.f32.mrb[4].mxu0 }
 0x37e   : > { %v986_v31 = vadd.f32 %v2452_v28, %v3628_v9  ;;  %v977_v32 = vpop.f32.mrb[5].mxu1  ;;  %2463 = vmatpush3.bf16.xpose.msra.mxu0 %v1065_v29  ;;  %2495 = vmatpush3.bf16.msra.mxu1 %v1024_v27  ;;  %v858_v33 = vadd.f32 %v2432_v30, %v3623_v7  ;;  %v849_v34 = vpop.f32.mrb[5].mxu0 }
 0x37f   : > { %v978_v35 = vadd.f32 %v3628_v9, %v977_v32  ;;  %v2453_v36 = vpop.f32.mrb[6].mxu1  ;;  %2551 = vmatprep.subr.msk.bf16.mxu0 %vm774_vm2, %v897_v24  ;;  %2496 = vmatprep.subr.bf16.mxu1 %v1025_v25  ;;  %v850_v37 = vadd.f32 %v3623_v7, %v849_v34  ;;  %v2433_v38 = vpop.f32.mrb[6].mxu0  ;;  %v1033_v32 = vld [vmem:[#allocation2 + $0x8] sm:$0xff]  ;;  %v1035_v34 = vld [vmem:[#allocation2 + $0x18] sm:$0xff] }
 0x380   : > { %v989_v39 = vadd.f32 %v2453_v36, %v3628_v9  ;;  %v980_v40 = vpop.f32.mrb[7].mxu1  ;;  %v861_v41 = vadd.f32 %v2433_v38, %v3623_v7  ;;  %v852_v42 = vpop.f32.mrb[7].mxu0  ;;  %v1037_v36 = vld [vmem:[#allocation2 + $0x28] sm:$0xff]  ;;  %v1039_v38 = vld [vmem:[#allocation2 + $0x38] sm:$0xff] }
 0x381   : > { %v981_v43 = vadd.f32 %v3628_v9, %v980_v40  ;;  %v853_v44 = vadd.f32 %v3623_v7, %v852_v42 }
 0x382   : > { %v1027_v45 = vpack.c.bf16 %v989_v39, %v986_v31  ;;  %2497 = vmatpush3.bf16.msra.mxu1 %v1025_v25  ;;  %v899_v46 = vpack.c.bf16 %v861_v41, %v858_v33  ;;  %v1034_v33 = vld [vmem:[#allocation2 + $0x10] sm:$0xff] }
 0x383   : > { %v1026_v47 = vpack.c.bf16 %v981_v43, %v978_v35  ;;  %v898_v48 = vpack.c.bf16 %v853_v44, %v850_v37  ;;  %v1036_v35 = vld [vmem:[#allocation2 + $0x20] sm:$0xff]  ;;  %v1038_v37 = vld [vmem:[#allocation2 + $0x30] sm:$0xff] }
 0x384   : > { %v1074_v29 = vsel %vm774_vm2, %v899_v46, 0 }
 0x385   : > { %2498 = vmatprep.subr.bf16.mxu1 %v1026_v47  ;;  %v2456_v50 = vpop.f32.mrb[8].mxu1  ;;  %v2436_v51 = vpop.f32.mrb[8].mxu0  ;;  %v1071_v6 = vsel %vm774_vm2, %v898_v48, 0 }
 0x386   : > { %2465 = vmatpush3.bf16.xpose.msra.mxu0 %v1068_v49  ;;  %2499 = vmatpush3.bf16.msra.mxu1 %v1026_v47  ;;  %v1002_v52 = vadd.f32 %v2456_v50, %v3628_v9  ;;  %v993_v53 = vpop.f32.mrb[9].mxu1  ;;  %v874_v54 = vadd.f32 %v2436_v51, %v3623_v7  ;;  %v865_v55 = vpop.f32.mrb[9].mxu0  ;;  %v3110_v49 = vmov 0  }
 0x387   : > { %2500 = vmatprep.subr.bf16.mxu1 %v1027_v45  ;;  %2552 = vmatprep.subr.msk.bf16.mxu0 %vm774_vm2, %v898_v48  ;;  %v994_v56 = vadd.f32 %v3628_v9, %v993_v53  ;;  %v2457_v57 = vpop.f32.mrb[10].mxu1  ;;  %v866_v58 = vadd.f32 %v3623_v7, %v865_v55  ;;  %v2437_v59 = vpop.f32.mrb[10].mxu0 }
 0x388   : > { %v1005_v60 = vadd.f32 %v2457_v57, %v3628_v9  ;;  %v996_v61 = vpop.f32.mrb[11].mxu1  ;;  %v877_v62 = vadd.f32 %v2437_v59, %v3623_v7  ;;  %v868_v63 = vpop.f32.mrb[11].mxu0  ;;  %2725 = vset.pattern.permute.xlu1 %v3110_v49  ;;  %2726 = vset.pattern.permute.xlu0 %v3110_v49  ;;  %v3735_v57 = vld [vmem:[#allocation3] sm:$0xff] }
 0x389   : > { %v997_v0 = vadd.f32 %v3628_v9, %v996_v61  ;;  %v869_v1 = vadd.f32 %v3623_v7, %v868_v63 }
 0x38a   : > { %2501 = vmatpush3.bf16.msra.mxu1 %v1027_v45  ;;  %v1029_v2 = vpack.c.bf16 %v1005_v60, %v1002_v52  ;;  %v901_v3 = vpack.c.bf16 %v877_v62, %v874_v54  ;;  %v3745_v62 = vld [vmem:[#allocation3 + $0x18] sm:$0xff] }
 0x38b   : > { %v1028_v4 = vpack.c.bf16 %v997_v0, %v994_v56  ;;  %v900_v5 = vpack.c.bf16 %v869_v1, %v866_v58  ;;  %v3733_v56 = vld [vmem:[#allocation3 + $0x10] sm:$0xff]  ;;  %v1186_v1 = vld [vmem:[#allocation3 + $0x8] sm:$0xff] }
 0x38d   : > { %2502 = vmatprep.subr.bf16.mxu1 %v1028_v4  ;;  %v2460_v8 = vpop.f32.mrb[12].mxu1  ;;  %v2440_v10 = vpop.f32.mrb[12].mxu0  ;;  %v1077_v30 = vsel %vm774_vm2, %v900_v5, 0 }
 0x38e   : > { %2467 = vmatpush3.bf16.xpose.msra.mxu0 %v1071_v6  ;;  %2503 = vmatpush3.bf16.msra.mxu1 %v1028_v4  ;;  %v1018_v11 = vadd.f32 %v2460_v8, %v3628_v9  ;;  %v1009_v12 = vpop.f32.mrb[13].mxu1  ;;  %v890_v13 = vadd.f32 %v2440_v10, %v3623_v7  ;;  %v881_v14 = vpop.f32.mrb[13].mxu0  ;;  %v3756_v4 = vld [vmem:[#allocation3 + $0x30] sm:$0xff]  ;;  %v3763_v8 = vld [vmem:[#allocation3 + $0x20] sm:$0xff] }
 0x38f   : > { %2553 = vmatprep.subr.msk.bf16.mxu0 %vm774_vm2, %v899_v46  ;;  %2504 = vmatprep.subr.bf16.mxu1 %v1029_v2  ;;  %v1010_v15 = vadd.f32 %v3628_v9, %v1009_v12  ;;  %v2461_v16 = vpop.f32.mrb[14].mxu1  ;;  %v882_v17 = vadd.f32 %v3623_v7, %v881_v14  ;;  %v2441_v18 = vpop.f32.mrb[14].mxu0  ;;  %v3771_v12 = vld [vmem:[#allocation3 + $0x38] sm:$0xff] }
 0x390   : > { %v1021_v19 = vadd.f32 %v2461_v16, %v3628_v9  ;;  %v1012_v20 = vpop.f32.mrb[15].mxu1  ;;  %v893_v21 = vadd.f32 %v2441_v18, %v3623_v7  ;;  %v884_v22 = vpop.f32.mrb[15].mxu0 }
 0x391   : > { %v1013_v23 = vadd.f32 %v3628_v9, %v1012_v20  ;;  %v885_v24 = vadd.f32 %v3623_v7, %v884_v22  ;;  %v1080_v7 = vsel %vm774_vm2, %v901_v3, 0 }
 0x392   : > { %2505 = vmatpush3.bf16.msra.mxu1 %v1029_v2  ;;  %v1031_v25 = vpack.c.bf16 %v1021_v19, %v1018_v11  ;;  %v903_v26 = vpack.c.bf16 %v893_v21, %v890_v13  ;;  %v3786_v19 = vld [vmem:[#allocation3 + $0x50] sm:$0xff] }
 0x393   : > { %v1030_v27 = vpack.c.bf16 %v1013_v23, %v1010_v15  ;;  %v902_v28 = vpack.c.bf16 %v885_v24, %v882_v17  ;;  %v3779_v15 = vld [vmem:[#allocation3 + $0x28] sm:$0xff]  ;;  %v3792_v23 = vld [vmem:[#allocation3 + $0x78] sm:$0xff] }
 0x394   : > { %v1086_v31 = vsel %vm774_vm2, %v903_v26, 0  ;;  %v3783_v17 = vld [vmem:[#allocation3 + $0x68] sm:$0xff] }
 0x395   : > { %2506 = vmatprep.subr.bf16.mxu1 %v1030_v27  ;;  %v1083_v9 = vsel %vm774_vm2, %v902_v28, 0 }
 0x396   : > { %2469 = vmatpush3.bf16.xpose.msra.mxu0 %v1074_v29  ;;  %2507 = vmatpush3.bf16.msra.mxu1 %v1030_v27 }
 0x397   : > { %2554 = vmatprep.subr.msk.bf16.mxu0 %vm774_vm2, %v900_v5  ;;  %2508 = vmatprep.subr.bf16.mxu1 %v1031_v25 }
 0x39a   : > { %2509 = vmatpush3.bf16.msra.mxu1 %v1031_v25  ;;  %v3799_v25 = vld [vmem:[#allocation3 + $0x40] sm:$0xff] }
 0x39e   : > { %2471 = vmatpush3.bf16.xpose.msra.mxu0 %v1077_v30 }
 0x39f   : > { %2555 = vmatprep.subr.msk.bf16.mxu0 %vm774_vm2, %v901_v3 }
 0x3a6   : > { %2473 = vmatpush3.bf16.xpose.msra.mxu0 %v1080_v7  ;;  %v1196_v7 = vld [vmem:[#allocation3 + $0x58] sm:$0xff] }
 0x3a7   : > { %2556 = vmatprep.subr.msk.bf16.mxu0 %vm774_vm2, %v902_v28 }
 0x3ae   : > { %2475 = vmatpush3.bf16.xpose.msra.mxu0 %v1083_v9 }
 0x3af   : > { %2557 = vmatprep.subr.msk.bf16.mxu0 %vm774_vm2, %v903_v26 }
 0x3b6   : > { %2477 = vmatpush3.bf16.xpose.msra.mxu0 %v1086_v31 }
 0x3bd   : > { %2479 = vmatmul.mubr.msk.bf16.vlgmr.msra.gmra.mrb[16].mxu0 %vm774_vm2, %v1033_v32  ;;  %v3817_v32 = vld [vmem:[#allocation3 + $0x48] sm:$0xff] }
 0x3be   : > { %2482 = vmatprep.mubr.msk.bf16.mxu0 %vm774_vm2, %v1034_v33 }
 0x3c5   : > { %2483 = vmatmul.mubr.msk.bf16.gmra.mrb[20].mxu0 %vm774_vm2, %v1035_v34 }
 0x3c6   : > { %2486 = vmatprep.mubr.msk.bf16.mxu0 %vm774_vm2, %v1036_v35 }
 0x3cd   : > { %2487 = vmatmul.mubr.msk.bf16.gmra.mrb[24].mxu0 %vm774_vm2, %v1037_v36 }
 0x3ce   : > { %2490 = vmatprep.mubr.msk.bf16.mxu0 %vm774_vm2, %v1038_v37  ;;  %v3824_v37 = vld [vmem:[#allocation3 + $0x70] sm:$0xff] }
 0x3d5   : > { %2491 = vmatmul.mubr.msk.bf16.gmra.mrb[28].mxu0 %vm774_vm2, %v1039_v38 }
 0x490   : > { %v3685_v39 = vpop.f32.mrb[16].mxu0 }
 0x491   : > { %1205 = vmax.xlane.f32.xlu0 %v3685_v39  ;;  %v3688_v40 = vpop.f32.mrb[17].mxu0 }
 0x492   : > { %1201 = vmax.xlane.f32.xlu1 %v3688_v40  ;;  %v3691_v41 = vpop.f32.mrb[18].mxu0 }
 0x493   : > { %v3693_v42 = vpop.f32.mrb[19].mxu0 }
 0x496   : > { %1207 = vmax.xlane.f32.xlu1 %v3691_v41 }
 0x498   : > { %v3696_v43 = vpop.f32.mrb[20].mxu0 }
 0x499   : > { %v3698_v44 = vpop.f32.mrb[21].mxu0 }
 0x49a   : > { %1203 = vmax.xlane.f32.xlu1 %v3693_v42  ;;  %v3701_v45 = vpop.f32.mrb[22].mxu0 }
 0x49b   : > { %v3703_v46 = vpop.f32.mrb[23].mxu0 }
 0x49e   : > { %1213 = vmax.xlane.f32.xlu1 %v3696_v43 }
 0x4a0   : > { %v3706_v47 = vpop.f32.mrb[24].mxu0 }
 0x4a1   : > { %v3708_v48 = vpop.f32.mrb[25].mxu0 }
 0x4a2   : > { %1209 = vmax.xlane.f32.xlu1 %v3698_v44  ;;  %v3711_v50 = vpop.f32.mrb[26].mxu0 }
 0x4a3   : > { %v3713_v51 = vpop.f32.mrb[27].mxu0 }
 0x4a6   : > { %1215 = vmax.xlane.f32.xlu1 %v3701_v45 }
 0x4a8   : > { %v3716_v52 = vpop.f32.mrb[28].mxu0 }
 0x4a9   : > { %v3718_v53 = vpop.f32.mrb[29].mxu0 }
 0x4aa   : > { %1211 = vmax.xlane.f32.xlu1 %v3703_v46  ;;  %v3721_v54 = vpop.f32.mrb[30].mxu0 }
 0x4ab   : > { %v3723_v55 = vpop.f32.mrb[31].mxu0 }
 0x4ac   : > { %1227 = vmax.xlane.f32.xlu0 %v3723_v55 }
 0x4ae   : > { %1221 = vmax.xlane.f32.xlu1 %v3706_v47 }
 0x4b0   : > { %1231 = vmax.xlane.f32.xlu0 %v3721_v54 }
 0x4b2   : > { %1217 = vmax.xlane.f32.xlu1 %v3708_v48 }
 0x4b6   : > { %1223 = vmax.xlane.f32.xlu1 %v3711_v50 }
 0x4ba   : > { %1219 = vmax.xlane.f32.xlu1 %v3713_v51 }
 0x4be   : > { %1229 = vmax.xlane.f32.xlu1 %v3716_v52 }
 0x4c2   : > { %1225 = vmax.xlane.f32.xlu1 %v3718_v53 }
 0x51e   : > { %v1206_v58 = vpop.xlane.xlu0 %1205 }
 0x51f   : > { %v3738_v59 = vmax.f32 %v3733_v56, %v1206_v58  ;;  %v1202_v60 = vpop.xlane.xlu1 %1201 }
 0x520   : > { %v3741_v61 = vmax.f32 %v3735_v57, %v1202_v60 }
 0x521   : > { %1773 = vst.msk [vmem:[#allocation3 + $0x10] sm:$0xff] %vm1513_vm3, %v3738_v59  ;;  %v1251_v38 = vsub.f32 %v3733_v56, %v3738_v59 }
 0x522   : > { %1771 = vst.msk [vmem:[#allocation3] sm:$0xff] %vm1513_vm3, %v3741_v61  ;;  %1299 = vperm.xlu1 %2725, %v3741_v61   ;;  %v1249_v33 = vsub.f32 %v3735_v57, %v3741_v61 }
 0x523   : > { %v1208_v63 = vpop.xlane.xlu1 %1207 }
 0x524   : > { %v3751_v0 = vmax.f32 %v3745_v62, %v1208_v63  ;;  %v1265_v49 = vmul.f32 1.442695, %v1249_v33  ;;  %v1197_v63 = vld [vmem:[#allocation3 + $0x60] sm:$0xff] }
 0x526   : > { %1774 = vst.msk [vmem:[#allocation3 + $0x18] sm:$0xff] %vm1513_vm3, %v3751_v0  ;;  %1309 = vperm.xlu1 %2725, %v3738_v59   ;;  %v1252_v57 = vsub.f32 %v3745_v62, %v3751_v0  ;;  %2733 = vpow2.f32 %v1265_v49 }
 0x527   : > { %v1204_v2 = vpop.xlane.xlu1 %1203 }
 0x528   : > { %v1234_v3 = vmax.f32 %v1186_v1, %v1204_v2  ;;  %v1271_v59 = vmul.f32 1.442695, %v1252_v57 }
 0x52a   : > { %1772 = vst.msk [vmem:[#allocation3 + $0x8] sm:$0xff] %vm1513_vm3, %v1234_v3  ;;  %1314 = vperm.xlu1 %2725, %v3751_v0   ;;  %1304 = vperm.xlu0 %2726, %v1234_v3   ;;  %v1250_v34 = vsub.f32 %v1186_v1, %v1234_v3  ;;  %v1269_v1 = vmul.f32 1.442695, %v1251_v38 }
 0x52b   : > { %v1214_v5 = vpop.xlane.xlu1 %1213 }
 0x52c   : > { %v3761_v6 = vmax.f32 %v3756_v4, %v1214_v5  ;;  %v1267_v58 = vmul.f32 1.442695, %v1250_v34 }
 0x52e   : > { %1777 = vst.msk [vmem:[#allocation3 + $0x30] sm:$0xff] %vm1513_vm3, %v3761_v6  ;;  %1329 = vperm.xlu1 %2725, %v3761_v6   ;;  %2735 = vpow2.f32 %v1267_v58  ;;  %v1255_v5 = vsub.f32 %v3756_v4, %v3761_v6 }
 0x52f   : > { %v1210_v10 = vpop.xlane.xlu1 %1209  ;;  %2737 = vpow2.f32 %v1269_v1 }
 0x530   : > { %v3769_v11 = vmax.f32 %v3763_v8, %v1210_v10  ;;  %2739 = vpow2.f32 %v1271_v59 }
 0x532   : > { %1775 = vst.msk [vmem:[#allocation3 + $0x20] sm:$0xff] %vm1513_vm3, %v3769_v11  ;;  %1319 = vperm.xlu1 %2725, %v3769_v11   ;;  %v1253_v2 = vsub.f32 %v3763_v8, %v3769_v11 }
 0x533   : > { %v1216_v13 = vpop.xlane.xlu1 %1215 }
 0x534   : > { %v3777_v14 = vmax.f32 %v3771_v12, %v1216_v13  ;;  %v1273_v10 = vmul.f32 1.442695, %v1253_v2  ;;  %v1277_v13 = vmul.f32 1.442695, %v1255_v5 }
 0x536   : > { %1778 = vst.msk [vmem:[#allocation3 + $0x38] sm:$0xff] %vm1513_vm3, %v3777_v14  ;;  %v1256_v8 = vsub.f32 %v3771_v12, %v3777_v14  ;;  %2741 = vpow2.f32 %v1273_v10 }
 0x537   : > { %v1212_v16 = vpop.xlane.xlu1 %1211 }
 0x538   : > { %v1238_v18 = vmax.f32 %v3779_v15, %v1212_v16  ;;  %v1279_v4 = vmul.f32 1.442695, %v1256_v8  ;;  %v3851_v16 = vpop.eup %2733 }
 0x539   : > { %v1228_v20 = vpop.xlane.xlu0 %1227 }
 0x53a   : > { %1776 = vst.msk [vmem:[#allocation3 + $0x28] sm:$0xff] %vm1513_vm3, %v1238_v18  ;;  %1324 = vperm.xlu1 %2725, %v1238_v18   ;;  %v3790_v21 = vmax.f32 %v3783_v17, %v1228_v20  ;;  %v1254_v62 = vsub.f32 %v3779_v15, %v1238_v18  ;;  %v3853_v18 = vpop.eup %2735 }
 0x53b   : > { %v1222_v22 = vpop.xlane.xlu1 %1221 }
 0x53c   : > { %v3795_v24 = vmax.f32 %v3786_v19, %v1222_v22  ;;  %1784 = vst.msk [vmem:[#allocation3 + $0x68] sm:$0xff] %vm1513_vm3, %v3790_v21  ;;  %v1275_v11 = vmul.f32 1.442695, %v1254_v62  ;;  %v3860_v22 = vpop.eup %2737 }
 0x53d   : > { %v1232_v26 = vpop.xlane.xlu0 %1231 }
 0x53e   : > { %1781 = vst.msk [vmem:[#allocation3 + $0x50] sm:$0xff] %vm1513_vm3, %v3795_v24  ;;  %1334 = vperm.xlu1 %2725, %v3777_v14   ;;  %v3805_v27 = vmax.f32 %v3792_v23, %v1232_v26  ;;  %v1259_v15 = vsub.f32 %v3786_v19, %v3795_v24  ;;  %2743 = vpow2.f32 %v1275_v11 }
 0x53f   : > { %v1218_v28 = vpop.xlane.xlu1 %1217  ;;  %2745 = vpow2.f32 %v1277_v13 }
 0x540   : > { %v3808_v29 = vmax.f32 %v3799_v25, %v1218_v28  ;;  %v1264_v30 = vsub.f32 %v3792_v23, %v3805_v27  ;;  %1786 = vst.msk [vmem:[#allocation3 + $0x78] sm:$0xff] %vm1513_vm3, %v3805_v27  ;;  %v1285_v20 = vmul.f32 1.442695, %v1259_v15  ;;  %2747 = vpow2.f32 %v1279_v4 }
 0x541   : > { %v1262_v28 = vsub.f32 %v3783_v17, %v3790_v21 }
 0x542   : > { %1779 = vst.msk [vmem:[#allocation3 + $0x40] sm:$0xff] %vm1513_vm3, %v3808_v29  ;;  %1339 = vperm.xlu1 %2725, %v3808_v29   ;;  %v1257_v12 = vsub.f32 %v3799_v25, %v3808_v29  ;;  %2749 = vpow2.f32 %v1285_v20 }
 0x543   : > { %v1224_v9 = vpop.xlane.xlu1 %1223 }
 0x544   : > { %v1244_v31 = vmax.f32 %v1196_v7, %v1224_v9  ;;  %v1281_v26 = vmul.f32 1.442695, %v1257_v12 }
 0x546   : > { %1782 = vst.msk [vmem:[#allocation3 + $0x58] sm:$0xff] %vm1513_vm3, %v1244_v31  ;;  %1349 = vperm.xlu1 %2725, %v3795_v24   ;;  %v1260_v6 = vsub.f32 %v1196_v7, %v1244_v31  ;;  %v3862_v24 = vpop.eup %2739 }
 0x547   : > { %v1220_v35 = vpop.xlane.xlu1 %1219  ;;  %v3868_v7 = vpop.eup %2741 }
 0x548   : > { %v1242_v36 = vmax.f32 %v3817_v32, %v1220_v35  ;;  %v1287_v14 = vmul.f32 1.442695, %v1260_v6  ;;  %v3870_v9 = vpop.eup %2743 }
 0x549   : > { %v3874_v17 = vpop.eup %2745 }
 0x54a   : > { %1780 = vst.msk [vmem:[#allocation3 + $0x48] sm:$0xff] %vm1513_vm3, %v1242_v36  ;;  %1344 = vperm.xlu0 %2726, %v1242_v36   ;;  %v1258_v19 = vsub.f32 %v3817_v32, %v1242_v36  ;;  %2751 = vpow2.f32 %v1287_v14 }
 0x54b   : > { %v1230_v60 = vpop.xlane.xlu1 %1229  ;;  %2753 = vpow2.f32 %v1281_v26 }
 0x54c   : > { %v3832_v61 = vmax.f32 %v3824_v37, %v1230_v60  ;;  %v1283_v25 = vmul.f32 1.442695, %v1258_v19 }
 0x54e   : > { %v1263_v56 = vsub.f32 %v3824_v37, %v3832_v61  ;;  %1785 = vst.msk [vmem:[#allocation3 + $0x70] sm:$0xff] %vm1513_vm3, %v3832_v61  ;;  %1354 = vperm.xlu0 %2726, %v1244_v31   ;;  %v1291_v31 = vmul.f32 1.442695, %v1262_v28  ;;  %2755 = vpow2.f32 %v1283_v25 }
 0x54f   : > { %v1226_v0 = vpop.xlane.xlu1 %1225 }
 0x550   : > { %v1245_v3 = vmax.f32 %v1197_v63, %v1226_v0  ;;  %2757 = vpow2.f32 %v1291_v31 }
 0x552   : > { %1783 = vst.msk [vmem:[#allocation3 + $0x60] sm:$0xff] %vm1513_vm3, %v1245_v3  ;;  %1359 = vperm.xlu1 %2725, %v1245_v3   ;;  %1364 = vperm.xlu0 %2726, %v3790_v21   ;;  %v1261_v29 = vsub.f32 %v1197_v63, %v1245_v3  ;;  %v3876_v21 = vpop.eup %2747 }
 0x553   : > { %v3880_v33 = vpop.eup %2749 }
 0x554   : > { %v1289_v32 = vmul.f32 1.442695, %v1261_v29  ;;  %v3882_v34 = vpop.eup %2751 }
 0x555   : > { %v3886_v35 = vpop.eup %2753 }
 0x556   : > { %1369 = vperm.xlu1 %2725, %v3832_v61   ;;  %1374 = vperm.xlu0 %2726, %v3805_v27   ;;  %2759 = vpow2.f32 %v1289_v32 }
 0x558   : > { %v3888_v36 = vpop.eup %2755 }
 0x55a   : > { %1553 = vperm.xlu1 %2725, %v3853_v18   ;;  %1548 = vperm.xlu0 %2726, %v3851_v16   ;;  %v3892_v38 = vpop.eup %2757 }
 0x55e   : > { %1558 = vperm.xlu1 %2725, %v3860_v22   ;;  %1563 = vperm.xlu0 %2726, %v3862_v24  }
 0x560   : > { %v3894_v49 = vpop.eup %2759 }
 0x562   : > { %1568 = vperm.xlu1 %2725, %v3868_v7   ;;  %1573 = vperm.xlu0 %2726, %v3870_v9  }
 0x566   : > { %1578 = vperm.xlu1 %2725, %v3874_v17   ;;  %1583 = vperm.xlu0 %2726, %v3876_v21  }
 0x56a   : > { %1598 = vperm.xlu1 %2725, %v3880_v33   ;;  %1603 = vperm.xlu0 %2726, %v3882_v34  }
 0x56e   : > { %1588 = vperm.xlu1 %2725, %v3886_v35   ;;  %1593 = vperm.xlu0 %2726, %v3888_v36  }
 0x572   : > { %1608 = vperm.xlu1 %2725, %v3894_v49   ;;  %1613 = vperm.xlu0 %2726, %v3892_v38  }
 0x5a1   : > { %v1300_v57 = vpop.permute.xlu1 %1299 }
 0x5a2   : > { %v1377_v58 = vsub.f32 %v3688_v40, %v1300_v57 }
 0x5a4   : > { %v1393_v60 = vmul.f32 1.442695, %v1377_v58 }
 0x5a5   : > { %v1310_v63 = vpop.permute.xlu1 %1309 }
 0x5a6   : > { %2761 = vpow2.f32 %v1393_v60  ;;  %v1379_v1 = vsub.f32 %v3685_v39, %v1310_v63 }
 0x5a8   : > { %v1397_v2 = vmul.f32 1.442695, %v1379_v1 }
 0x5a9   : > { %v1315_v59 = vpop.permute.xlu1 %1314  ;;  %v1305_v62 = vpop.permute.xlu0 %1304 }
 0x5aa   : > { %2763 = vpow2.f32 %v1397_v2  ;;  %v1380_v0 = vsub.f32 %v3691_v41, %v1315_v59  ;;  %v1378_v3 = vsub.f32 %v3693_v42, %v1305_v62 }
 0x5ac   : > { %v1399_v5 = vmul.f32 1.442695, %v1380_v0  ;;  %v1395_v10 = vmul.f32 1.442695, %v1378_v3 }
 0x5ad   : > { %v1330_v8 = vpop.permute.xlu1 %1329 }
 0x5ae   : > { %2765 = vpow2.f32 %v1399_v5  ;;  %v1383_v11 = vsub.f32 %v3696_v43, %v1330_v8 }
 0x5af   : > { %2767 = vpow2.f32 %v1395_v10 }
 0x5b0   : > { %v2762_v40 = vpop.eup %2761  ;;  %v1405_v13 = vmul.f32 1.442695, %v1383_v11 }
 0x5b1   : > { %1425 = vadd.xlane.f32.xlu1 %v2762_v40  ;;  %v1320_v15 = vpop.permute.xlu1 %1319 }
 0x5b2   : > { %2769 = vpow2.f32 %v1405_v13  ;;  %v1381_v39 = vsub.f32 %v3698_v44, %v1320_v15 }
 0x5b4   : > { %v2764_v4 = vpop.eup %2763  ;;  %v1401_v6 = vmul.f32 1.442695, %v1381_v39 }
 0x5b5   : > { %1429 = vadd.xlane.f32.xlu0 %v2764_v4 }
 0x5b6   : > { %2771 = vpow2.f32 %v1401_v6 }
 0x5b8   : > { %v2766_v41 = vpop.eup %2765 }
 0x5b9   : > { %v2768_v42 = vpop.eup %2767  ;;  %1431 = vadd.xlane.f32.xlu1 %v2766_v41  ;;  %v1325_v20 = vpop.permute.xlu1 %1324  ;;  %v1458_v12 = vpack.c.bf16 %v2766_v41, %v2764_v4 }
 0x5ba   : > { %v1382_v14 = vsub.f32 %v3703_v46, %v1325_v20  ;;  %1427 = vadd.xlane.f32.xlu0 %v2768_v42  ;;  %v1457_v43 = vpack.c.bf16 %v2768_v42, %v2762_v40 }
 0x5bc   : > { %v2770_v19 = vpop.eup %2769  ;;  %v1403_v26 = vmul.f32 1.442695, %v1382_v14  ;;  %2510 = vmatprep.mubr.bf16.mxu1 %v1457_v43 }
 0x5bd   : > { %2511 = vmatmul.mubr.bf16.vlgmr.msra.gmra.mrb[16].mxu1 %v1458_v12  ;;  %v1335_v28 = vpop.permute.xlu1 %1334 }
 0x5be   : > { %2773 = vpow2.f32 %v1403_v26  ;;  %v1384_v44 = vsub.f32 %v3701_v45, %v1335_v28  ;;  %1437 = vadd.xlane.f32.xlu0 %v2770_v19  ;;  %v1293_v28 = vmul.f32 1.442695, %v1263_v56 }
 0x5c0   : > { %v2772_v25 = vpop.eup %2771  ;;  %v1407_v29 = vmul.f32 1.442695, %v1384_v44  ;;  %v1295_v44 = vmul.f32 1.442695, %v1264_v30 }
 0x5c1   : > { %v1340_v31 = vpop.permute.xlu1 %1339 }
 0x5c2   : > { %2775 = vpow2.f32 %v1407_v29  ;;  %1433 = vadd.xlane.f32.xlu0 %v2772_v25  ;;  %v1385_v32 = vsub.f32 %v3708_v48, %v1340_v31 }
 0x5c4   : > { %v1409_v63 = vmul.f32 1.442695, %v1385_v32 }
 0x5c5   : > { %v1350_v57 = vpop.permute.xlu1 %1349 }
 0x5c6   : > { %v1387_v46 = vsub.f32 %v3706_v47, %v1350_v57 }
 0x5c8   : > { %v2774_v58 = vpop.eup %2773  ;;  %v1413_v60 = vmul.f32 1.442695, %v1387_v46 }
 0x5c9   : > { %v1345_v1 = vpop.permute.xlu0 %1344  ;;  %v1459_v2 = vpack.c.bf16 %v2774_v58, %v2772_v25 }
 0x5ca   : > { %2777 = vpow2.f32 %v1413_v60  ;;  %v1386_v59 = vsub.f32 %v3713_v51, %v1345_v1  ;;  %v1465_v1 = vld [vmem:[#allocation4] sm:$0xff] }
 0x5cb   : > { %2514 = vmatprep.mubr.bf16.mxu1 %v1459_v2  ;;  %2779 = vpow2.f32 %v1409_v63  ;;  %v1481_v2 = vmul.f32 %v3851_v16, %v1465_v1 }
 0x5cc   : > { %v2776_v45 = vpop.eup %2775  ;;  %v1411_v62 = vmul.f32 1.442695, %v1386_v59 }
 0x5cd   : > { %1439 = vadd.xlane.f32.xlu1 %v2776_v45  ;;  %v1355_v0 = vpop.permute.xlu0 %1354  ;;  %v1460_v3 = vpack.c.bf16 %v2776_v45, %v2770_v19 }
 0x5ce   : > { %2781 = vpow2.f32 %v1411_v62  ;;  %v1388_v48 = vsub.f32 %v3711_v50, %v1355_v0  ;;  %v1467_v62 = vld [vmem:[#allocation4 + $0x10] sm:$0xff] }
 0x5cf   : > { %2515 = vmatmul.mubr.bf16.gmra.mrb[20].mxu1 %v1460_v3  ;;  %v1483_v3 = vmul.f32 %v3860_v22, %v1467_v62 }
 0x5d0   : > { %v1415_v47 = vmul.f32 1.442695, %v1388_v48 }
 0x5d1   : > { %1435 = vadd.xlane.f32.xlu1 %v2774_v58  ;;  %v1360_v5 = vpop.permute.xlu1 %1359  ;;  %v1365_v10 = vpop.permute.xlu0 %1364 }
 0x5d2   : > { %2783 = vpow2.f32 %v1415_v47  ;;  %v1389_v8 = vsub.f32 %v3718_v53, %v1360_v5  ;;  %v1390_v51 = vsub.f32 %v3723_v55, %v1365_v10  ;;  %v1468_v47 = vld [vmem:[#allocation4 + $0x18] sm:$0xff]  ;;  %v1466_v10 = vld [vmem:[#allocation4 + $0x8] sm:$0xff] }
 0x5d3   : > { %v1482_v16 = vmul.f32 %v3853_v18, %v1466_v10  ;;  %v1472_v18 = vld [vmem:[#allocation4 + $0x38] sm:$0xff]  ;;  %v1477_v10 = vld [vmem:[#allocation4 + $0x60] sm:$0xff] }
 0x5d4   : > { %v2778_v11 = vpop.eup %2777  ;;  %v1417_v40 = vmul.f32 1.442695, %v1389_v8  ;;  %v1419_v13 = vmul.f32 1.442695, %v1390_v51  ;;  %v1484_v8 = vmul.f32 %v3862_v24, %v1468_v47 }
 0x5d5   : > { %v1370_v15 = vpop.permute.xlu1 %1369  ;;  %1445 = vadd.xlane.f32.xlu0 %v2778_v11  ;;  %v1375_v39 = vpop.permute.xlu0 %1374 }
 0x5d6   : > { %2785 = vpow2.f32 %v1417_v40  ;;  %v1391_v4 = vsub.f32 %v3716_v52, %v1370_v15  ;;  %v1392_v50 = vsub.f32 %v3721_v54, %v1375_v39  ;;  %v2780_v6 = vpop.eup %2779 }
 0x5d7   : > { %2787 = vpow2.f32 %v1419_v13  ;;  %v1471_v13 = vld [vmem:[#allocation4 + $0x30] sm:$0xff] }
 0x5d8   : > { %v2782_v41 = vpop.eup %2781  ;;  %v1421_v42 = vmul.f32 1.442695, %v1391_v4  ;;  %v1423_v20 = vmul.f32 1.442695, %v1392_v50  ;;  %v1487_v22 = vmul.f32 %v3874_v17, %v1471_v13  ;;  %v1469_v4 = vld [vmem:[#allocation4 + $0x20] sm:$0xff] }
 0x5d9   : > { %1441 = vadd.xlane.f32.xlu0 %v2780_v6  ;;  %v1461_v53 = vpack.c.bf16 %v2782_v41, %v2780_v6  ;;  %v3926_v31 = vpop.permute.xlu1 %1553  ;;  %v3928_v32 = vpop.permute.xlu0 %1548  ;;  %v1485_v24 = vmul.f32 %v3868_v7, %v1469_v4  ;;  %v1531_v4 = vld [vmem:[#allocation5 + $0x8] sm:$0xff] }
 0x5da   : > { %2789 = vpow2.f32 %v1421_v42  ;;  %v1488_v42 = vmul.f32 %v3876_v21, %v1472_v18  ;;  %v1627_v18 = vmul.f32 %v3926_v31, %v1531_v4 }
 0x5db   : > { %2791 = vpow2.f32 %v1423_v20  ;;  %2518 = vmatprep.mubr.bf16.mxu1 %v1461_v53  ;;  %v1470_v53 = vld [vmem:[#allocation4 + $0x28] sm:$0xff] }
 0x5dc   : > { %v2784_v55 = vpop.eup %2783  ;;  %2793 = vpow2.f32 %v1293_v28  ;;  %v1486_v17 = vmul.f32 %v3870_v9, %v1470_v53  ;;  %v1476_v28 = vld [vmem:[#allocation4 + $0x58] sm:$0xff] }
 0x5dd   : > { %1447 = vadd.xlane.f32.xlu1 %v2784_v55  ;;  %v1462_v12 = vpack.c.bf16 %v2784_v55, %v2778_v11  ;;  %2795 = vpow2.f32 %v1295_v44  ;;  %v3930_v37 = vpop.permute.xlu1 %1558  ;;  %v3932_v61 = vpop.permute.xlu0 %1563  ;;  %v1492_v9 = vmul.f32 %v3882_v34, %v1476_v28 }
 0x5df   : > { %2519 = vmatmul.mubr.bf16.gmra.mrb[24].mxu1 %v1462_v12 }
 0x5e0   : > { %v2786_v14 = vpop.eup %2785 }
 0x5e1   : > { %v2788_v43 = vpop.eup %2787  ;;  %1443 = vadd.xlane.f32.xlu1 %v2782_v41  ;;  %v3934_v56 = vpop.permute.xlu1 %1568 }
 0x5e2   : > { %v1463_v52 = vpack.c.bf16 %v2788_v43, %v2786_v14  ;;  %v3936_v23 = vpop.permute.xlu0 %1573 }
 0x5e4   : > { %v2790_v19 = vpop.eup %2789  ;;  %2522 = vmatprep.mubr.bf16.mxu1 %v1463_v52 }
 0x5e5   : > { %v2792_v54 = vpop.eup %2791  ;;  %1453 = vadd.xlane.f32.xlu0 %v2790_v19  ;;  %v3938_v27 = vpop.permute.xlu1 %1578 }
 0x5e6   : > { %1455 = vadd.xlane.f32.xlu1 %v2792_v54  ;;  %v1464_v26 = vpack.c.bf16 %v2792_v54, %v2790_v19  ;;  %v3920_v25 = vpop.eup %2793  ;;  %v3940_v30 = vpop.permute.xlu0 %1583  ;;  %v1473_v19 = vld [vmem:[#allocation4 + $0x40] sm:$0xff] }
 0x5e7   : > { %v3923_v29 = vpop.eup %2795  ;;  %v1489_v21 = vmul.f32 %v3886_v35, %v1473_v19 }
 0x5e8   : > { %2523 = vmatmul.mubr.bf16.gmra.mrb[28].mxu1 %v1464_v26 }
 0x5e9   : > { %1449 = vadd.xlane.f32.xlu0 %v2786_v14  ;;  %v3942_v57 = vpop.permute.xlu1 %1598  ;;  %v1475_v14 = vld [vmem:[#allocation4 + $0x50] sm:$0xff] }
 0x5ea   : > { %1451 = vadd.xlane.f32.xlu1 %v2788_v43  ;;  %v3944_v46 = vpop.permute.xlu0 %1603  ;;  %v1491_v7 = vmul.f32 %v3880_v33, %v1475_v14 }
 0x5ed   : > { %v3946_v58 = vpop.permute.xlu1 %1588 }
 0x5ee   : > { %v3948_v60 = vpop.permute.xlu0 %1593 }
 0x5f1   : > { %v3950_v63 = vpop.permute.xlu1 %1608 }
 0x5f2   : > { %v3953_v59 = vpop.permute.xlu0 %1613 }
 0x5fb   : > { %1618 = vperm.xlu1 %2725, %v3920_v25  }
 0x5ff   : > { %1623 = vperm.xlu0 %2726, %v3923_v29  }
 0x63e   : > { %v1426_v45 = vpop.xlane.xlu1 %1425 }
 0x63f   : > { %v1497_v0 = vadd.f32 %v1481_v2, %v1426_v45  ;;  %v1474_v2 = vld [vmem:[#allocation4 + $0x48] sm:$0xff] }
 0x640   : > { %v1490_v33 = vmul.f32 %v3888_v36, %v1474_v2  ;;  %v1493_v36 = vmul.f32 %v3894_v49, %v1477_v10  ;;  %v1539_v2 = vld [vmem:[#allocation5 + $0x48] sm:$0xff] }
 0x641   : > { %1514 = vst.msk [vmem:[#allocation4] sm:$0xff] %vm1513_vm3, %v1497_v0  ;;  %v1479_v0 = vld [vmem:[#allocation4 + $0x70] sm:$0xff] }
 0x642   : > { %v1430_v48 = vpop.xlane.xlu0 %1429  ;;  %v1495_v35 = vmul.f32 %v3920_v25, %v1479_v0 }
 0x643   : > { %v1499_v5 = vadd.f32 %v1483_v3, %v1430_v48  ;;  %v1480_v48 = vld [vmem:[#allocation4 + $0x78] sm:$0xff] }
 0x644   : > { %v1496_v47 = vmul.f32 %v3923_v29, %v1480_v48  ;;  %v1532_v29 = vld [vmem:[#allocation5 + $0x10] sm:$0xff] }
 0x645   : > { %1516 = vst.msk [vmem:[#allocation4 + $0x10] sm:$0xff] %vm1513_vm3, %v1499_v5 }
 0x646   : > { %v1432_v51 = vpop.xlane.xlu1 %1431 }
 0x647   : > { %v1500_v11 = vadd.f32 %v1484_v8, %v1432_v51  ;;  %v1428_v40 = vpop.xlane.xlu0 %1427  ;;  %v1478_v51 = vld [vmem:[#allocation4 + $0x68] sm:$0xff] }
 0x648   : > { %v1498_v15 = vadd.f32 %v1482_v16, %v1428_v40 }
 0x649   : > { %1517 = vst.msk [vmem:[#allocation4 + $0x18] sm:$0xff] %vm1513_vm3, %v1500_v11  ;;  %v1494_v11 = vmul.f32 %v3892_v38, %v1478_v51  ;;  %v1543_v51 = vld [vmem:[#allocation5 + $0x68] sm:$0xff] }
 0x64a   : > { %1515 = vst.msk [vmem:[#allocation4 + $0x8] sm:$0xff] %vm1513_vm3, %v1498_v15 }
 0x64b   : > { %v1438_v39 = vpop.xlane.xlu0 %1437 }
 0x64c   : > { %v1503_v50 = vadd.f32 %v1487_v22, %v1438_v39  ;;  %v1530_v22 = vld [vmem:[#allocation5] sm:$0xff]  ;;  %v1533_v39 = vld [vmem:[#allocation5 + $0x18] sm:$0xff] }
 0x64d   : > { %v1626_v49 = vmul.f32 %v3928_v32, %v1530_v22  ;;  %v1536_v32 = vld [vmem:[#allocation5 + $0x30] sm:$0xff] }
 0x64e   : > { %1520 = vst.msk [vmem:[#allocation4 + $0x30] sm:$0xff] %vm1513_vm3, %v1503_v50  ;;  %v1628_v50 = vmul.f32 %v3930_v37, %v1532_v29  ;;  %v1534_v37 = vld [vmem:[#allocation5 + $0x20] sm:$0xff]  ;;  %v1632_v14 = vmul.f32 %v3938_v27, %v1536_v32 }
 0x64f   : > { %v1434_v6 = vpop.xlane.xlu0 %1433  ;;  %v1630_v31 = vmul.f32 %v3934_v56, %v1534_v37  ;;  %v1540_v56 = vld [vmem:[#allocation5 + $0x50] sm:$0xff]  ;;  %v1538_v27 = vld [vmem:[#allocation5 + $0x40] sm:$0xff] }
 0x650   : > { %v1501_v41 = vadd.f32 %v1485_v24, %v1434_v6  ;;  %v1629_v6 = vmul.f32 %v3932_v61, %v1533_v39  ;;  %v1537_v61 = vld [vmem:[#allocation5 + $0x38] sm:$0xff] }
 0x652   : > { %1518 = vst.msk [vmem:[#allocation4 + $0x20] sm:$0xff] %vm1513_vm3, %v1501_v41 }
 0x65a   : > { %v1440_v20 = vpop.xlane.xlu1 %1439 }
 0x65b   : > { %v1504_v55 = vadd.f32 %v1488_v42, %v1440_v20 }
 0x65d   : > { %1521 = vst.msk [vmem:[#allocation4 + $0x38] sm:$0xff] %vm1513_vm3, %v1504_v55 }
 0x65e   : > { %v1436_v12 = vpop.xlane.xlu1 %1435 }
 0x65f   : > { %v1502_v43 = vadd.f32 %v1486_v17, %v1436_v12  ;;  %v1535_v12 = vld [vmem:[#allocation5 + $0x28] sm:$0xff] }
 0x661   : > { %1519 = vst.msk [vmem:[#allocation4 + $0x28] sm:$0xff] %vm1513_vm3, %v1502_v43 }
 0x662   : > { %v1446_v52 = vpop.xlane.xlu0 %1445 }
 0x663   : > { %v1507_v54 = vadd.f32 %v1491_v7, %v1446_v52  ;;  %v1633_v7 = vmul.f32 %v3940_v30, %v1537_v61  ;;  %v1541_v30 = vld [vmem:[#allocation5 + $0x58] sm:$0xff] }
 0x665   : > { %1524 = vst.msk [vmem:[#allocation4 + $0x50] sm:$0xff] %vm1513_vm3, %v1507_v54  ;;  %v1631_v54 = vmul.f32 %v3936_v23, %v1535_v12  ;;  %v1634_v23 = vmul.f32 %v3946_v58, %v1538_v27  ;;  %v1542_v58 = vld [vmem:[#allocation5 + $0x60] sm:$0xff] }
 0x666   : > { %v1442_v26 = vpop.xlane.xlu0 %1441 }
 0x667   : > { %v1505_v44 = vadd.f32 %v1489_v21, %v1442_v26 }
 0x669   : > { %1522 = vst.msk [vmem:[#allocation4 + $0x40] sm:$0xff] %vm1513_vm3, %v1505_v44 }
 0x66a   : > { %v1448_v1 = vpop.xlane.xlu1 %1447 }
 0x66b   : > { %v1508_v45 = vadd.f32 %v1492_v9, %v1448_v1  ;;  %v1636_v1 = vmul.f32 %v3942_v57, %v1540_v56  ;;  %v1544_v57 = vld [vmem:[#allocation5 + $0x70] sm:$0xff] }
 0x66c   : > { %v1817_v12 = vld [vmem:[#allocation4 + $0x50] sm:$0xff] (!%p2311_p12) }
 0x66d   : > { %1525 = vst.msk [vmem:[#allocation4 + $0x58] sm:$0xff] %vm1513_vm3, %v1508_v45 }
 0x66e   : > { %v1444_v62 = vpop.xlane.xlu1 %1443 }
 0x66f   : > { %v1506_v3 = vadd.f32 %v1490_v33, %v1444_v62  ;;  %v1637_v33 = vmul.f32 %v3944_v46, %v1541_v30  ;;  %v1545_v46 = vld [vmem:[#allocation5 + $0x78] sm:$0xff] }
 0x671   : > { %1523 = vst.msk [vmem:[#allocation4 + $0x48] sm:$0xff] %vm1513_vm3, %v1506_v3  ;;  %v1635_v3 = vmul.f32 %v3948_v60, %v1539_v2  ;;  %v1948_v2 = vld [vmem:[%s4240_s4 + $0x8] sm:$0xff] (!%p2311_p12) }
 0x672   : > { %v1454_v5 = vpop.xlane.xlu0 %1453 }
 0x673   : > { %v1456_v34 = vpop.xlane.xlu1 %1455  ;;  %v1511_v8 = vadd.f32 %v1495_v35, %v1454_v5 }
 0x674   : > { %v1512_v16 = vadd.f32 %v1496_v47, %v1456_v34  ;;  %v1818_v37 = vld [vmem:[#allocation4 + $0x58] sm:$0xff] (!%p2311_p12) }
 0x675   : > { %1528 = vst.msk [vmem:[#allocation4 + $0x70] sm:$0xff] %vm1513_vm3, %v1511_v8 }
 0x676   : > { %1529 = vst.msk [vmem:[#allocation4 + $0x78] sm:$0xff] %vm1513_vm3, %v1512_v16  ;;  %v1450_v40 = vpop.xlane.xlu0 %1449  ;;  %v1638_v16 = vmul.f32 %v3950_v63, %v1542_v58  ;;  %v1809_v63 = vld [vmem:[#allocation4 + $0x10] sm:$0xff] (!%p2311_p12) }
 0x677   : > { %v1452_v13 = vpop.xlane.xlu1 %1451  ;;  %v1509_v15 = vadd.f32 %v1493_v36, %v1450_v40  ;;  %2801 = vrcp.f32 (!%p2311_p12), %v1809_v63 }
 0x678   : > { %v1510_v25 = vadd.f32 %v1494_v11, %v1452_v13 }
 0x679   : > { %1526 = vst.msk [vmem:[#allocation4 + $0x60] sm:$0xff] %vm1513_vm3, %v1509_v15  ;;  %v1639_v15 = vmul.f32 %v3953_v59, %v1543_v51  ;;  %v3111_v59 = vmov (!%p2311_p12), 0  }
 0x67a   : > { %1527 = vst.msk [vmem:[#allocation4 + $0x68] sm:$0xff] %vm1513_vm3, %v1510_v25  ;;  %2798 = vset.pattern.permute.xlu1 (!%p2311_p12), %v3111_v59  ;;  %2797 = vset.pattern.permute.xlu0 (!%p2311_p12), %v3111_v59 }
 0x67b   : > { %v1619_v34 = vpop.permute.xlu1 %1618 }
 0x67c   : > { %v1640_v60 = vmul.f32 %v1619_v34, %v1544_v57 }
 0x67e   : > { %v1624_v8 = vpop.permute.xlu0 %1623 }
 0x67f   : > { %v1641_v11 = vmul.f32 %v1624_v8, %v1545_v46 }
 0x690   : > { %v2512_v24 = vpop.f32.mrb[16].mxu1 }
 0x691   : > { %v1741_v38 = vadd.f32 %v2512_v24, %v1628_v50  ;;  %v1676_v41 = vpop.f32.mrb[17].mxu1  ;;  %v1807_v50 = vld [vmem:[#allocation4] sm:$0xff] (!%p2311_p12)  ;;  %v1808_v24 = vld [vmem:[#allocation4 + $0x8] sm:$0xff] (!%p2311_p12) }
 0x692   : > { %v1739_v42 = vadd.f32 %v1676_v41, %v1626_v49  ;;  %v2513_v20 = vpop.f32.mrb[18].mxu1  ;;  %v1810_v49 = vld [vmem:[#allocation4 + $0x18] sm:$0xff] (!%p2311_p12)  ;;  %2803 = vrcp.f32 (!%p2311_p12), %v1807_v50 }
 0x693   : > { %1757 = vst.msk [vmem:[#allocation5 + $0x10] sm:$0xff] %vm774_vm2, %v1741_v38  ;;  %v1742_v53 = vadd.f32 %v2513_v20, %v1629_v6  ;;  %v1679_v55 = vpop.f32.mrb[19].mxu1  ;;  %2805 = vrcp.f32 (!%p2311_p12), %v1810_v49  ;;  %v1812_v6 = vld [vmem:[#allocation4 + $0x28] sm:$0xff] (!%p2311_p12)  ;;  %v1811_v38 = vld [vmem:[#allocation4 + $0x20] sm:$0xff] (!%p2311_p12)  ;;  %v1814_v41 = vld [vmem:[#allocation4 + $0x38] sm:$0xff] (!%p2311_p12) }
 0x694   : > { %1755 = vst.msk [vmem:[#allocation5] sm:$0xff] %vm774_vm2, %v1739_v42  ;;  %v1740_v17 = vadd.f32 %v1679_v55, %v1627_v18  ;;  %2807 = vrcp.f32 (!%p2311_p12), %v1808_v24  ;;  %v1813_v18 = vld [vmem:[#allocation4 + $0x30] sm:$0xff] (!%p2311_p12)  ;;  %v2802_v42 = vpop.eup (!%p2311_p12), %2801 }
 0x695   : > { %1758 = vst.msk [vmem:[#allocation5 + $0x18] sm:$0xff] %vm774_vm2, %v1742_v53  ;;  %2809 = vrcp.f32 (!%p2311_p12), %v1812_v6  ;;  %1851 = vperm.xlu1 (!%p2311_p12), %2798, %v2802_v42   ;;  %v1816_v53 = vld [vmem:[#allocation4 + $0x48] sm:$0xff] (!%p2311_p12) }
 0x696   : > { %1756 = vst.msk [vmem:[#allocation5 + $0x8] sm:$0xff] %vm774_vm2, %v1740_v17  ;;  %2811 = vrcp.f32 (!%p2311_p12), %v1811_v38  ;;  %v1815_v17 = vld [vmem:[#allocation4 + $0x40] sm:$0xff] (!%p2311_p12) }
 0x697   : > { %2813 = vrcp.f32 (!%p2311_p12), %v1814_v41 }
 0x698   : > { %2815 = vrcp.f32 (!%p2311_p12), %v1813_v18 }
 0x699   : > { %2817 = vrcp.f32 (!%p2311_p12), %v1816_v53 }
 0x69a   : > { %2819 = vrcp.f32 (!%p2311_p12), %v1815_v17 }
 0x69b   : > { %2821 = vrcp.f32 (!%p2311_p12), %v1818_v37 }
 0x69c   : > { %v2804_v20 = vpop.eup (!%p2311_p12), %2803  ;;  %2823 = vrcp.f32 (!%p2311_p12), %v1817_v12 }
 0x69d   : > { %v2806_v55 = vpop.eup (!%p2311_p12), %2805  ;;  %1841 = vperm.xlu0 (!%p2311_p12), %2797, %v2804_v20  }
 0x69e   : > { %v2808_v32 = vpop.eup (!%p2311_p12), %2807  ;;  %1856 = vperm.xlu1 (!%p2311_p12), %2798, %v2806_v55  }
 0x69f   : > { %v2810_v61 = vpop.eup (!%p2311_p12), %2809 }
 0x6a1   : > { %1846 = vperm.xlu0 (!%p2311_p12), %2797, %v2808_v32  }
 0x6a2   : > { %v2516_v43 = vpop.f32.mrb[20].mxu1  ;;  %1866 = vperm.xlu1 (!%p2311_p12), %2798, %v2810_v61  }
 0x6a3   : > { %v1745_v52 = vadd.f32 %v2516_v43, %v1632_v14  ;;  %v1692_v19 = vpop.f32.mrb[21].mxu1  ;;  %v2812_v14 = vpop.eup (!%p2311_p12), %2811 }
 0x6a4   : > { %v1743_v21 = vadd.f32 %v1692_v19, %v1630_v31  ;;  %v2517_v26 = vpop.f32.mrb[22].mxu1  ;;  %v1820_v31 = vld [vmem:[#allocation4 + $0x68] sm:$0xff] (!%p2311_p12)  ;;  %v2814_v43 = vpop.eup (!%p2311_p12), %2813  ;;  %v1822_v19 = vld [vmem:[#allocation4 + $0x78] sm:$0xff] (!%p2311_p12) }
 0x6a5   : > { %1761 = vst.msk [vmem:[#allocation5 + $0x30] sm:$0xff] %vm774_vm2, %v1745_v52  ;;  %v1746_v28 = vadd.f32 %v2517_v26, %v1633_v7  ;;  %v1695_v44 = vpop.f32.mrb[23].mxu1  ;;  %1861 = vperm.xlu0 (!%p2311_p12), %2797, %v2812_v14   ;;  %v1819_v7 = vld [vmem:[#allocation4 + $0x60] sm:$0xff] (!%p2311_p12)  ;;  %v2816_v52 = vpop.eup (!%p2311_p12), %2815  ;;  %2825 = vrcp.f32 (!%p2311_p12), %v1820_v31 }
 0x6a6   : > { %1759 = vst.msk [vmem:[#allocation5 + $0x20] sm:$0xff] %vm774_vm2, %v1743_v21  ;;  %v1744_v9 = vadd.f32 %v1695_v44, %v1631_v54  ;;  %1876 = vperm.xlu1 (!%p2311_p12), %2798, %v2814_v43   ;;  %2827 = vrcp.f32 (!%p2311_p12), %v1819_v7  ;;  %v2818_v54 = vpop.eup (!%p2311_p12), %2817  ;;  %v1821_v21 = vld [vmem:[#allocation4 + $0x70] sm:$0xff] (!%p2311_p12) }
 0x6a7   : > { %1762 = vst.msk [vmem:[#allocation5 + $0x38] sm:$0xff] %vm774_vm2, %v1746_v28  ;;  %v2820_v26 = vpop.eup (!%p2311_p12), %2819  ;;  %2829 = vrcp.f32 (!%p2311_p12), %v1822_v19 }
 0x6a8   : > { %1760 = vst.msk [vmem:[#allocation5 + $0x28] sm:$0xff] %vm774_vm2, %v1744_v9  ;;  %2831 = vrcp.f32 (!%p2311_p12), %v1821_v21  ;;  %v2822_v28 = vpop.eup (!%p2311_p12), %2821 }
 0x6a9   : > { %1871 = vperm.xlu0 (!%p2311_p12), %2797, %v2816_v52   ;;  %v2824_v44 = vpop.eup (!%p2311_p12), %2823 }
 0x6aa   : > { %1886 = vperm.xlu1 (!%p2311_p12), %2798, %v2818_v54  }
 0x6ac   : > { %v1797_v49 = vld [vmem:[#allocation5 + $0x30] sm:$0xff] (!%p2311_p12) }
 0x6ad   : > { %1881 = vperm.xlu0 (!%p2311_p12), %2797, %v2820_v26  }
 0x6ae   : > { %1896 = vperm.xlu1 (!%p2311_p12), %2798, %v2822_v28   ;;  %v1798_v50 = vld [vmem:[#allocation5 + $0x38] sm:$0xff] (!%p2311_p12) }
 0x6af   : > { %v2826_v9 = vpop.eup (!%p2311_p12), %2825 }
 0x6b0   : > { %v2828_v56 = vpop.eup (!%p2311_p12), %2827 }
 0x6b1   : > { %1891 = vperm.xlu0 (!%p2311_p12), %2797, %v2824_v44   ;;  %v2830_v27 = vpop.eup (!%p2311_p12), %2829 }
 0x6b2   : > { %v2520_v45 = vpop.f32.mrb[24].mxu1  ;;  %1906 = vperm.xlu1 (!%p2311_p12), %2798, %v2826_v9   ;;  %v2832_v30 = vpop.eup (!%p2311_p12), %2831 }
 0x6b3   : > { %v1749_v62 = vadd.f32 %v2520_v45, %v1636_v1  ;;  %v1708_v0 = vpop.f32.mrb[25].mxu1  ;;  %v1947_v1 = vld [vmem:[%s4239_s19] sm:$0xff] (!%p2311_p12)  ;;  %v1950_v45 = vld [vmem:[%s4240_s4 + $0x18] sm:$0xff] (!%p2311_p12) }
 0x6b4   : > { %v1747_v48 = vadd.f32 %v1708_v0, %v1634_v23  ;;  %v2521_v35 = vpop.f32.mrb[26].mxu1  ;;  %v1949_v23 = vld [vmem:[%s4240_s4 + $0x10] sm:$0xff] (!%p2311_p12) }
 0x6b5   : > { %1765 = vst.msk [vmem:[#allocation5 + $0x50] sm:$0xff] %vm774_vm2, %v1749_v62  ;;  %v1750_v47 = vadd.f32 %v2521_v35, %v1637_v33  ;;  %v1711_v5 = vpop.f32.mrb[27].mxu1  ;;  %1901 = vperm.xlu0 (!%p2311_p12), %2797, %v2828_v56   ;;  %v2799_v33 = vld [vmem:[#allocation12] sm:$0xff] (!%p2311_p12)   ;;  %v2800_v62 = vld [vmem:[#allocation12 + $0x8] sm:$0xff] (!%p2311_p12)   ;;  %v1794_v35 = vld [vmem:[#allocation5 + $0x18] sm:$0xff] (!%p2311_p12) }
 0x6b6   : > { %1763 = vst.msk [vmem:[#allocation5 + $0x40] sm:$0xff] %vm774_vm2, %v1747_v48  ;;  %v1748_v10 = vadd.f32 %v1711_v5, %v1635_v3  ;;  %1916 = vperm.xlu1 (!%p2311_p12), %2798, %v2830_v27   ;;  %v1793_v3 = vld [vmem:[#allocation5 + $0x10] sm:$0xff] (!%p2311_p12)  ;;  %v1792_v5 = vld [vmem:[#allocation5 + $0x8] sm:$0xff] (!%p2311_p12) }
 0x6b7   : > { %1766 = vst.msk [vmem:[#allocation5 + $0x58] sm:$0xff] %vm774_vm2, %v1750_v47  ;;  %v1791_v47 = vld [vmem:[#allocation5] sm:$0xff] (!%p2311_p12) }
 0x6b8   : > { %1764 = vst.msk [vmem:[#allocation5 + $0x48] sm:$0xff] %vm774_vm2, %v1748_v10 }
 0x6b9   : > { %1911 = vperm.xlu0 (!%p2311_p12), %2797, %v2832_v30  }
 0x6ba   : > { %1953 = vperm.xlu1 (!%p2311_p12), %2798, %v1947_v1  }
 0x6bb   : > { %v2524_v36 = vpop.f32.mrb[28].mxu1  ;;  %1790 = sbr.rel (%p2311_p12) target bundleno = 2113 (0x841), region = 84 }
 0x6bc   : > { %v1753_v40 = vadd.f32 %v2524_v36, %v1640_v60  ;;  %v1724_v13 = vpop.f32.mrb[29].mxu1  ;;  %v1801_v43 = vld [vmem:[#allocation5 + $0x50] sm:$0xff] (!%p2311_p12) }
 0x6bd   : > { %v1751_v25 = vadd.f32 %v1724_v13, %v1638_v16  ;;  %v2525_v29 = vpop.f32.mrb[30].mxu1  ;;  %v1795_v13 = vld [vmem:[#allocation5 + $0x20] sm:$0xff] (!%p2311_p12) }
 0x6be   : > { %1769 = vst.msk [vmem:[#allocation5 + $0x70] sm:$0xff] %vm774_vm2, %v1753_v40  ;;  %v1754_v22 = vadd.f32 %v2525_v29, %v1641_v11  ;;  %v1727_v39 = vpop.f32.mrb[31].mxu1  ;;  %1958 = vperm.xlu1 (!%p2311_p12), %2798, %v1948_v2   ;;  %v1796_v40 = vld [vmem:[#allocation5 + $0x28] sm:$0xff] (!%p2311_p12)  ;;  %v1799_v53 = vld [vmem:[#allocation5 + $0x40] sm:$0xff] (!%p2311_p12)  ;;  %v1802_v31 = vld [vmem:[#allocation5 + $0x58] sm:$0xff] (!%p2311_p12) }
 0x6bf   : > { %1767 = vst.msk [vmem:[#allocation5 + $0x60] sm:$0xff] %vm774_vm2, %v1751_v25  ;;  %v1752_v4 = vadd.f32 %v1727_v39, %v1639_v15  ;;  %v1800_v20 = vld [vmem:[#allocation5 + $0x48] sm:$0xff] (!%p2311_p12) }
 0x6c0   : > { %1770 = vst.msk [vmem:[#allocation5 + $0x78] sm:$0xff] %vm774_vm2, %v1754_v22 }
 0x6c1   : > { %1768 = vst.msk [vmem:[#allocation5 + $0x68] sm:$0xff] %vm774_vm2, %v1752_v4 }
 0x6c2   : > { %1963 = vperm.xlu1 %2798, %v1949_v23  }
 0x6c5   : > { %v1805_v2 = vld [vmem:[#allocation5 + $0x70] sm:$0xff] }
 0x6c6   : > { %1968 = vperm.xlu1 %2798, %v1950_v45   ;;  %v1803_v28 = vld [vmem:[#allocation5 + $0x60] sm:$0xff] }
 0x6c7   : > { %v1806_v1 = vld [vmem:[#allocation5 + $0x78] sm:$0xff] }
 0x6c8   : > { %v1804_v26 = vld [vmem:[#allocation5 + $0x68] sm:$0xff] }
 0x6d7   : > { %1983 = vxpose.xlu0.c.b16.start [1/2] (short) (narrow) %v2799_v33, 32 }
 0x6db   : > { %1984 = vxpose.xlu0.c.b16.end [2/2] (short) (narrow) %v2800_v62, 32 }
 0x714   : > { %v1852_v0 = vpop.permute.xlu1 %1851 }
 0x715   : > { %v1921_v10 = vmul.f32 %v1852_v0, %v1793_v3 }
 0x71c   : > { %v1842_v48 = vpop.permute.xlu0 %1841 }
 0x71d   : > { %v1857_v57 = vpop.permute.xlu1 %1856  ;;  %v1919_v46 = vmul.f32 %v1842_v48, %v1791_v47 }
 0x71e   : > { %v1922_v34 = vmul.f32 %v1857_v57, %v1794_v35 }
 0x720   : > { %v1847_v58 = vpop.permute.xlu0 %1846  ;;  %v1936_v51 = vpack.c.bf16 %v1922_v34, %v1921_v10  ;;  %v2322_v10 = vld [vmem:[%s3488_s27] sm:$0xff]  }
 0x721   : > { %v1920_v8 = vmul.f32 %v1847_v58, %v1792_v5  ;;  %v1867_v11 = vpop.permute.xlu1 %1866  ;;  %v2329_v5 = vld [vmem:[%s3488_s27 + $0x8] sm:$0xff]   ;;  %v2323_v58 = vunpack.c.l.bf16 %v2322_v10 }
 0x722   : > { %v1924_v25 = vmul.f32 %v1867_v11, %v1796_v40  ;;  %v2009_v4 = vsel %vm774_vm2, %v1936_v51, 0  ;;  %v2327_v57 = vunpack.c.l.bf16 %v2329_v5  ;;  %v2324_v11 = vunpack.c.h.bf16 %v2322_v10 }
 0x723   : > { %v1935_v60 = vpack.c.bf16 %v1920_v8, %v1919_v46 }
 0x724   : > { %v1862_v16 = vpop.permute.xlu0 %1861 }
 0x725   : > { %2558 = vmatprep.subr.msk.bf16.mxu0 %vm774_vm2, %v1935_v60  ;;  %v2006_v36 = vsel %vm774_vm2, %v1935_v60, 0  ;;  %v1923_v29 = vmul.f32 %v1862_v16, %v1795_v13  ;;  %v1877_v63 = vpop.permute.xlu1 %1876 }
 0x726   : > { %2527 = vmatpush3.bf16.xpose.msra.mxu0 %v2006_v36  ;;  %v1926_v24 = vmul.f32 %v1877_v63, %v1798_v50 }
 0x727   : > { %2559 = vmatprep.subr.msk.bf16.mxu0 %vm774_vm2, %v1936_v51  ;;  %v1937_v39 = vpack.c.bf16 %v1924_v25, %v1923_v29  ;;  %v2328_v51 = vunpack.c.h.bf16 %v2329_v5 }
 0x728   : > { %v1872_v15 = vpop.permute.xlu0 %1871 }
 0x729   : > { %v1925_v6 = vmul.f32 %v1872_v15, %v1797_v49  ;;  %v2012_v18 = vsel %vm774_vm2, %v1937_v39, 0  ;;  %v1887_v42 = vpop.permute.xlu1 %1886 }
 0x72a   : > { %v1928_v55 = vmul.f32 %v1887_v42, %v1800_v20 }
 0x72b   : > { %v1938_v41 = vpack.c.bf16 %v1926_v24, %v1925_v6 }
 0x72c   : > { %v1882_v22 = vpop.permute.xlu0 %1881 }
 0x72d   : > { %v1927_v17 = vmul.f32 %v1882_v22, %v1799_v53  ;;  %v2015_v61 = vsel %vm774_vm2, %v1938_v41, 0  ;;  %v1897_v14 = vpop.permute.xlu1 %1896 }
 0x72e   : > { %2529 = vmatpush3.bf16.xpose.msra.mxu0 %v2009_v4  ;;  %v1930_v7 = vmul.f32 %v1897_v14, %v1802_v31 }
 0x72f   : > { %2560 = vmatprep.subr.msk.bf16.mxu0 %vm774_vm2, %v1937_v39  ;;  %v1939_v37 = vpack.c.bf16 %v1928_v55, %v1927_v17 }
 0x730   : > { %v1892_v59 = vpop.permute.xlu0 %1891 }
 0x731   : > { %v1929_v52 = vmul.f32 %v1892_v59, %v1801_v43  ;;  %v2018_v54 = vsel %vm774_vm2, %v1939_v37, 0  ;;  %v1907_v21 = vpop.permute.xlu1 %1906 }
 0x732   : > { %v1932_v44 = vmul.f32 %v1907_v21, %v1804_v26 }
 0x733   : > { %v1940_v19 = vpack.c.bf16 %v1930_v7, %v1929_v52 }
 0x734   : > { %v1902_v38 = vpop.permute.xlu0 %1901 }
 0x735   : > { %v1931_v9 = vmul.f32 %v1902_v38, %v1803_v28  ;;  %v2021_v27 = vsel %vm774_vm2, %v1940_v19, 0  ;;  %v1917_v30 = vpop.permute.xlu1 %1916 }
 0x736   : > { %2531 = vmatpush3.bf16.xpose.msra.mxu0 %v2012_v18  ;;  %v1934_v23 = vmul.f32 %v1917_v30, %v1806_v1 }
 0x737   : > { %2561 = vmatprep.subr.msk.bf16.mxu0 %vm774_vm2, %v1938_v41  ;;  %v1941_v56 = vpack.c.bf16 %v1932_v44, %v1931_v9 }
 0x738   : > { %v1912_v32 = vpop.permute.xlu0 %1911 }
 0x739   : > { %v1933_v45 = vmul.f32 %v1912_v32, %v1805_v2  ;;  %v2024_v62 = vsel %vm774_vm2, %v1941_v56, 0  ;;  %v1954_v48 = vpop.permute.xlu1 %1953 }
 0x73b   : > { %v1942_v33 = vpack.c.bf16 %v1934_v23, %v1933_v45 }
 0x73d   : > { %v1991_v12 = vpop.trf.xlu0  ;;  %v2027_v0 = vsel %vm774_vm2, %v1942_v33, 0  ;;  %v1959_v35 = vpop.permute.xlu1 %1958 }
 0x73e   : > { %2533 = vmatpush3.bf16.xpose.msra.mxu0 %v2015_v61  ;;  %2542 = vmatprep.mubr.msk.bf16.mxu0 %vm774_vm2, %v1991_v12 }
 0x73f   : > { %2562 = vmatprep.subr.msk.bf16.mxu0 %vm774_vm2, %v1939_v37 }
 0x741   : > { %v1992_v3 = vpop.trf.xlu0  ;;  %v1964_v47 = vpop.permute.xlu1 %1963 }
 0x745   : > { %v1969_v60 = vpop.permute.xlu1 %1968 }
 0x746   : > { %2535 = vmatpush3.bf16.xpose.msra.mxu0 %v2018_v54 }
 0x747   : > { %2563 = vmatprep.subr.msk.bf16.mxu0 %vm774_vm2, %v1940_v19 }
 0x74e   : > { %2537 = vmatpush3.bf16.xpose.msra.mxu0 %v2021_v27 }
 0x74f   : > { %2564 = vmatprep.subr.msk.bf16.mxu0 %vm774_vm2, %v1941_v56 }
 0x756   : > { %2539 = vmatpush3.bf16.xpose.msra.mxu0 %v2024_v62 }
 0x757   : > { %2565 = vmatprep.subr.msk.bf16.mxu0 %vm774_vm2, %v1942_v33 }
 0x75e   : > { %2541 = vmatpush3.bf16.xpose.msra.mxu0 %v2027_v0 }
 0x765   : > { %2543 = vmatmul.mubr.msk.bf16.vlgmr.msra.gmra.mrb[0].mxu0 %vm774_vm2, %v1992_v3 }
 0x838   : > { %v2544_v34 = vpop.f32.mrb[0].mxu0 }
 0x839   : > { %v2072_v46 = vadd.f32 %v2544_v34, %v1964_v47  ;;  %v2063_v8 = vpop.f32.mrb[1].mxu0 }
 0x83a   : > { %v2064_v16 = vadd.f32 %v2063_v8, %v1954_v48  ;;  %v2545_v36 = vpop.f32.mrb[2].mxu0 }
 0x83b   : > { %v2088_v40 = vadd.f32 %v2327_v57, %v2072_v46  ;;  %v2075_v13 = vadd.f32 %v2545_v36, %v1969_v60  ;;  %v2066_v15 = vpop.f32.mrb[3].mxu0 }
 0x83c   : > { %v2086_v25 = vadd.f32 %v2323_v58, %v2064_v16  ;;  %v2067_v29 = vadd.f32 %v2066_v15, %v1959_v35 }
 0x83d   : > { %2092 = vst [vmem:[%s3512_s17 + $0x10] sm:$0xff] %v2088_v40  ;;  %v2089_v22 = vadd.f32 %v2328_v51, %v2075_v13 }
 0x83e   : > { %2090 = vst [vmem:[%s3512_s17] sm:$0xff] %v2086_v25  ;;  %v2087_v39 = vadd.f32 %v2324_v11, %v2067_v29 }
 0x83f   : > { %2093 = vst [vmem:[%s3512_s17 + $0x18] sm:$0xff] %v2089_v22 }
 0x840   : > { %2091 = vst [vmem:[%s3512_s17 + $0x8] sm:$0xff] %v2087_v39 }
 0x841 PF: > { %s4241_s27 = sld [smem:[#allocation25_spill]]  ;;  %s4242_s16 = sld [smem:[#allocation24_spill]] }
 0x842   : > { %s4243_s28 = sld [smem:[#allocation29_spill]]  ;;  %s2109_s20 = sshll.u32 %s3512_s17, 4  ;;  %s4056_s20 = int_to_ptr.vmem [resolvable:$true] %s2109_s20 }
 0x843   : > { %s4244_s21 = sld [smem:[#allocation41_spill]]  ;;  %s2095_s8 = scalar_lea.sflag [#allocation8], %s3484_s0 }
 0x844   : > { %s2949_s1 = scalar_lea.vmem %s4056_s20, 512 }
 0x845   : > { %p2950_p2 = scmp.ne.s32.totalorder %s4056_s20, %s2949_s1 }
 0x847   : > { %s2317_s10 = sshll.u32 %s4241_s27, 3  ;;  %s3112_s27 = smov [#allocation14]  }
 0x848   : > { %s2106_s7 = sadd.s32 %s4242_s16, %s2317_s10  ;;  %p4246_p10 = scmp.ne.s32.totalorder %s4243_s28, 0 }
 0x849   : > { %s2318_s19 = sshll.u32 %s2106_s7, 7  ;;  %s4245_s29 = smov %s4244_s21 }
 0x84a   : > { %s4061_s3 = scalar_lea.hbm %s4244_s21, %s2318_s19  ;;  %p2951_p8 = pnand %p2950_p2, %p4246_p10 }
 0x84b   : > { %s2953_s16 = sshll.u32 %s3112_s27, 4  ;;  %s2954_s16 = int_to_ptr.vmem [resolvable:$false] %s2953_s16 }
 0x84c   : > { %p2952_p4 = pneg %p2951_p8  ;;  %s2955_s17 = scalar_lea.vmem %s2954_s16, 1024 }
 0x84d   : > { %p2956_p3 = scmp.lt.s32.totalorder %s4056_s20, %s2954_s16  ;;  %p2957_p0 = scmp.lt.s32.totalorder %s2955_s17, %s2949_s1 }
 0x84f   : > { %p2958_p7 = por %p2957_p0, %p2956_p3 }
 0x851   : > { %p2959_p1 = pnand %p2958_p7, %p2952_p4 }
 0x853   : > { %2962 = shalt.err (!%p2959_p1)
}
 0x854   : > { %s2963_s10 = scalar_lea.hbm %s4061_s3, 512  ;;  %s2967_s2 = scalar_lea.hbm %s4245_s29, 2048 }
 0x855   : > { %p2964_p9 = scmp.ne.s32.totalorder %s4061_s3, %s2963_s10  ;;  %p2968_p11 = scmp.lt.u32.totalorder %s4061_s3, %s4245_s29 }
 0x856   : > { %p2969_p13 = scmp.lt.u32.totalorder %s2967_s2, %s2963_s10  ;;  %p2971_p2 = scmp.lt.u32.totalorder %s2963_s10, %s4061_s3 }
 0x857   : > { %p2965_p6 = pnand %p2964_p9, %p4246_p10 }
 0x858   : > { %p2970_p12 = por %p2969_p13, %p2968_p11 }
 0x859   : > { %p2966_p5 = pneg %p2965_p6 }
 0x85a   : > { %p2972_p8 = por %p2971_p2, %p2970_p12 }
 0x85c   : > { %p2973_p4 = pnand %p2972_p8, %p2966_p5 }
 0x85e   : > { %2976 = shalt.err (!%p2973_p4)
}
 0x85f   : > { %s3113_s1 = smov 128   ;;  %s3114_s27 = smov 256  }
 0x860   : > { %s3115_s16 = smov 8  }
 0x861   : > { %2578 = dma.vmem_to_hbm [thread:$0]  (%p4246_p10), %s4056_s20, 512, %s4061_s3, %s2095_s8, %s3113_s1, %s3114_s27, %s3115_s16  }
 0x862 PF: > { %s4247_s17 = sld [smem:[#allocation21_spill]]  ;;  %p2603_p3 = scmp.ge.s32.totalorder %s3099_s25, 2 }
 0x863   : > { %s4248_s7 = sld [smem:[#allocation30_spill]] }
 0x868   : > { %s2124_s19 = sand.u32 1, %s4247_s17  }
 0x869   : > { %p4249_p0 = scmp.ne.s32.totalorder %s4248_s7, 0  ;;  %s2125_s10 = scalar_lea.sflag [#allocation8], %s2124_s19 }
 0x86b   : > { %p2595_p7 = pnand %p2603_p3, %p4249_p0 }
 0x86d   : > { %3046 = dma.done.wait (!%p2595_p7), %s2125_s10, 512  }
 0x86e   : > { %3048 = vsyncadd (!%p2595_p7), %s2125_s10, 4294966784  ;;  %s30_s25 = sadd.s32 1, %s3099_s25   ;;  %s4251_s13 = sld [smem:[#allocation20_spill]] }
 0x86f   : > { %p4092_p1 = scmp.ge.s32.totalorder %s30_s25, 10   ;;  %s4252_s16 = sld [smem:[#allocation22_spill]] }
 0x870   : > { %s4253_s0 = smov %s3434_s14  ;;  %s4254_s14 = smov %s3059_s15 }
 0x871   : > { %s4255_s15 = smov %s3439_s11  ;;  %s4256_s17 = smov %s3071_s18 }
 0x872   : > { %s4257_s18 = smov %s4253_s0  ;;  %s4258_s19 = smov %s3087_s22 }
 0x873   : > { %s4259_s20 = smov %s3091_s23  ;;  %s4260_s21 = smov %s3095_s24 }
 0x874   : > { %s4261_s22 = smov %s4265_s30  ;;  %s4262_s23 = smov %s4269_s9 }
 0x875   : > { %s4263_s24 = smov %s4273_s12  ;;  %29 = sbr.rel (!%p4092_p1) target bundleno = 25 (0x19), region = 134 }
 0x87c   :  { %2130 = vsyncpa [#allocation7], 1 }
 0x87d   :  { %2132 = vsyncpa [#allocation7 + $0x1], 1 }
 0x87e   :  { %2133 = vsyncpa [#allocation10], 1 }
 0x87f   :  { %2135 = vsyncpa [#allocation10 + $0x1], 1 }
 0x880   :  { %2136 = vsyncpa [#allocation13], 1 }
 0x881   :  { %2137 = vsyncpa [#allocation8], 1 }
 0x882   :  { %2139 = vsyncpa [#allocation8 + $0x1], 1 }

</bundles_post_ra>
